<compile_context>
chip_gen: v7x
topology: tpu7x:2x2x1
jax: 0.10.0
libtpu: 0.0.40
codegen_flags: <defaults>
</compile_context>

<pallas_src>
import functools

import jax
import jax.numpy as jnp
from jax import lax
from jax.experimental import pallas as pl
from jax.experimental.pallas import tpu as pltpu


# ---------------------------------------------------------------------------
# Fused Pallas loss kernel
# ---------------------------------------------------------------------------
def _fused_pix2pix_loss_kernel(df_ref, dr_ref, ga_ref, y_ref, f_ref, out_ref,
                               *, inv_n_logits, inv_n_img, recon_weight):
    """Fused reduction producing [gen_loss, disc_loss].

    BCE-with-logits in the numerically-stable form used by PyTorch:
        loss = max(x, 0) - x * t + log(1 + exp(-|x|))
    All inputs are full VMEM blocks (tiny: ~25-50 KB each), so a single
    ungridded block is the right shape for this launch-bound workload.
    """

    def bce_sum(x, target):
        return jnp.sum(
            jnp.maximum(x, 0.0) - x * target + jnp.log1p(jnp.exp(-jnp.abs(x))))

    disc_fake_loss = bce_sum(df_ref[...], 0.0) * inv_n_logits
    disc_real_loss = bce_sum(dr_ref[...], 1.0) * inv_n_logits
    gen_adv_loss = bce_sum(ga_ref[...], 1.0) * inv_n_logits
    gen_recon_loss = jnp.sum(jnp.abs(y_ref[...] - f_ref[...])) * inv_n_img

    out_ref[0] = gen_adv_loss + gen_recon_loss * recon_weight        # gen_loss
    out_ref[1] = (disc_fake_loss + disc_real_loss) * 0.5             # disc_loss


def _as_2d(x):
    """Collapse leading dims (free, layout-preserving reshape), keep last dim."""
    return x.reshape(-1, x.shape[-1]).astype(jnp.float32)


def fused_pix2pix_losses(disc_fake_hat, disc_real_hat, gen_adv_hat,
                         y_real, fake, reconstruction_loss_weight):
    """One pallas_call computing (gen_loss, disc_loss)."""
    n_logits = float(disc_fake_hat.size)
    n_img = float(y_real.size)

    kern = functools.partial(
        _fused_pix2pix_loss_kernel,
        inv_n_logits=1.0 / n_logits,
        inv_n_img=1.0 / n_img,
        recon_weight=float(reconstruction_loss_weight),
    )

    # TODO(synk): if batch/resolution grow, switch to a 1-D grid over row tiles
    # with a VMEM accumulator (pl.when init/finalize) sized for v7x's 64 MiB
    # VMEM and mark the axis "parallel"; at these sizes a single block is best.
    out = pl.pallas_call(
        kern,
        out_shape=jax.ShapeDtypeStruct((2,), jnp.float32),
        in_specs=[pl.BlockSpec(memory_space=pltpu.MemorySpace.VMEM)] * 5,
        out_specs=pl.BlockSpec(memory_space=pltpu.MemorySpace.SMEM),
    )(_as_2d(disc_fake_hat), _as_2d(disc_real_hat), _as_2d(gen_adv_hat),
      _as_2d(y_real), _as_2d(fake))

    return out[0], out[1]


# ---------------------------------------------------------------------------
# Synthetic generator / discriminator (external args to forward; plain JAX)
# ---------------------------------------------------------------------------
def make_generator(key, in_ch=1, out_ch=1):
    k1, k2 = jax.random.split(key)
    # 1x1x1 channel-mixing "conv" + tanh
    w = jax.random.normal(k1, (out_ch, in_ch), jnp.float32) * 0.1
    b = jax.random.normal(k2, (out_ch,), jnp.float32) * 0.01

    def generator(x):  # x: (B, C, D, H, W)
        y = jnp.einsum("oc,bcdhw->bodhw", w, x) + b[None, :, None, None, None]
        return jnp.tanh(y)

    return generator


def make_discriminator(key, in_ch=1):
    k1, k2 = jax.random.split(key)
    # PatchGAN-style 3D conv: kernel (1, 2, 2), stride 1, VALID padding
    # (B, 2*C, 3, 32, 32) -> (B, 1, 3, 31, 31) logits
    w = jax.random.normal(k1, (1, 2 * in_ch, 1, 2, 2), jnp.float32) * 0.2
    b = jax.random.normal(k2, (1,), jnp.float32) * 0.01

    def discriminator(img, cond):  # both (B, C, D, H, W)
        x = jnp.concatenate([img, cond], axis=1)
        y = lax.conv_general_dilated(
            x, w,
            window_strides=(1, 1, 1),
            padding="VALID",
            dimension_numbers=("NCDHW", "OIDHW", "NCDHW"),
        )
        return y + b[None, :, None, None, None]

    return discriminator


# ---------------------------------------------------------------------------
# Pix2PixLoss forward
# ---------------------------------------------------------------------------
def pix2pix_loss_forward(x_real, y_real, generator, discriminator,
                         reconstruction_loss_weight):
    # real_label = 1, fake_label = 0 over the (B, 1, 3, 31, 31) logits grid;
    # the constant targets, 1/n means, /2 and the recon weight are all folded
    # into the single fused Pallas loss kernel.
    # TODO(synk): torch.cuda.amp.autocast (fp16 mixed precision) is not
    # reproduced; all compute stays in float32.

    # Generator runs ONCE; the discriminator's "fake" branch sees the detached
    # value (identical forward value to the PyTorch double-call structure).
    fake = generator(x_real)
    fake_detached = lax.stop_gradient(fake)

    disc_fake_hat = discriminator(fake_detached, x_real)   # detached branch
    disc_real_hat = discriminator(y_real, x_real)
    gen_adv_hat = discriminator(fake, x_real)               # grad-carrying branch

    gen_loss, disc_loss = fused_pix2pix_losses(
        disc_fake_hat, disc_real_hat, gen_adv_hat,
        y_real, fake, reconstruction_loss_weight)

    return gen_loss, disc_loss, fake_detached


# ---------------------------------------------------------------------------
# Demo
# ---------------------------------------------------------------------------
if __name__ == "__main__":
    key = jax.random.PRNGKey(0)
    k_x, k_y, k_g, k_d = jax.random.split(key, 4)

    B, C, D, H, W = 2, 1, 3, 32, 32   # -> discriminator logits (2, 1, 3, 31, 31)
    x_real = jax.random.normal(k_x, (B, C, D, H, W), jnp.float32)
    y_real = jax.random.normal(k_y, (B, C, D, H, W), jnp.float32)

    generator = make_generator(k_g, in_ch=C, out_ch=C)
    discriminator = make_discriminator(k_d, in_ch=C)
    recon_weight = 100.0

    gen_loss, disc_loss, fake = jax.jit(
        lambda xr, yr: pix2pix_loss_forward(
            xr, yr, generator, discriminator, recon_weight)
    )(x_real, y_real)

    jax.block_until_ready((gen_loss, disc_loss, fake))

    assert fake.shape == (B, C, D, H, W)
    assert gen_loss.shape == () and disc_loss.shape == ()
    assert bool(jnp.isfinite(gen_loss)) and bool(jnp.isfinite(disc_loss))

    print("KERNEL_OK")
</pallas_src>

<mosaic_0001>
module attributes {stable_mosaic.version = 11 : i64} {
  func.func @_fused_pix2pix_loss_kernel(%arg0: memref<186x31xf32, #tpu.memory_space<vmem>>, %arg1: memref<186x31xf32, #tpu.memory_space<vmem>>, %arg2: memref<186x31xf32, #tpu.memory_space<vmem>>, %arg3: memref<192x32xf32, #tpu.memory_space<vmem>>, %arg4: memref<192x32xf32, #tpu.memory_space<vmem>>, %arg5: memref<2xf32, #tpu.memory_space<smem>>) attributes {dimension_semantics = [], scalar_prefetch = 0 : i64, scratch_operands = 0 : i64, tpu.core_type = #tpu.core_type<tc>} {
    %c0 = arith.constant 0 : index
    %c0_0 = arith.constant 0 : index
    %0 = vector.load %arg0[%c0, %c0_0] : memref<186x31xf32, #tpu.memory_space<vmem>>, vector<186x31xf32>
    %cst = arith.constant 0.000000e+00 : f32
    %1 = vector.broadcast %cst : f32 to vector<186x31xf32>
    %2 = arith.maximumf %0, %1 : vector<186x31xf32>
    %cst_1 = arith.constant 0.000000e+00 : f32
    %3 = vector.broadcast %cst_1 : f32 to vector<186x31xf32>
    %4 = arith.mulf %0, %3 : vector<186x31xf32>
    %5 = arith.subf %2, %4 : vector<186x31xf32>
    %6 = math.absf %0 : vector<186x31xf32>
    %cst_2 = arith.constant 0.000000e+00 : f32
    %7 = vector.broadcast %cst_2 : f32 to vector<186x31xf32>
    %8 = arith.subf %7, %6 : vector<186x31xf32>
    %9 = math.exp %8 : vector<186x31xf32>
    %10 = math.log1p %9 : vector<186x31xf32>
    %11 = arith.addf %5, %10 : vector<186x31xf32>
    %12 = vector.shape_cast %11 : vector<186x31xf32> to vector<1x186x31xf32>
    %cst_3 = arith.constant dense<0.000000e+00> : vector<1xf32>
    %13 = vector.multi_reduction <add>, %12, %cst_3 [1, 2] : vector<1x186x31xf32> to vector<1xf32>
    %14 = vector.shape_cast %13 : vector<1xf32> to vector<1x1x1xf32>
    %15 = vector.extract %14[0, 0, 0] : f32 from vector<1x1x1xf32>
    %cst_4 = arith.constant 1.73430453E-4 : f32
    %16 = arith.mulf %15, %cst_4 : f32
    %c0_5 = arith.constant 0 : index
    %c0_6 = arith.constant 0 : index
    %17 = vector.load %arg1[%c0_5, %c0_6] : memref<186x31xf32, #tpu.memory_space<vmem>>, vector<186x31xf32>
    %cst_7 = arith.constant 0.000000e+00 : f32
    %18 = vector.broadcast %cst_7 : f32 to vector<186x31xf32>
    %19 = arith.maximumf %17, %18 : vector<186x31xf32>
    %cst_8 = arith.constant 1.000000e+00 : f32
    %20 = vector.broadcast %cst_8 : f32 to vector<186x31xf32>
    %21 = arith.mulf %17, %20 : vector<186x31xf32>
    %22 = arith.subf %19, %21 : vector<186x31xf32>
    %23 = math.absf %17 : vector<186x31xf32>
    %cst_9 = arith.constant 0.000000e+00 : f32
    %24 = vector.broadcast %cst_9 : f32 to vector<186x31xf32>
    %25 = arith.subf %24, %23 : vector<186x31xf32>
    %26 = math.exp %25 : vector<186x31xf32>
    %27 = math.log1p %26 : vector<186x31xf32>
    %28 = arith.addf %22, %27 : vector<186x31xf32>
    %29 = vector.shape_cast %28 : vector<186x31xf32> to vector<1x186x31xf32>
    %cst_10 = arith.constant dense<0.000000e+00> : vector<1xf32>
    %30 = vector.multi_reduction <add>, %29, %cst_10 [1, 2] : vector<1x186x31xf32> to vector<1xf32>
    %31 = vector.shape_cast %30 : vector<1xf32> to vector<1x1x1xf32>
    %32 = vector.extract %31[0, 0, 0] : f32 from vector<1x1x1xf32>
    %cst_11 = arith.constant 1.73430453E-4 : f32
    %33 = arith.mulf %32, %cst_11 : f32
    %c0_12 = arith.constant 0 : index
    %c0_13 = arith.constant 0 : index
    %34 = vector.load %arg2[%c0_12, %c0_13] : memref<186x31xf32, #tpu.memory_space<vmem>>, vector<186x31xf32>
    %cst_14 = arith.constant 0.000000e+00 : f32
    %35 = vector.broadcast %cst_14 : f32 to vector<186x31xf32>
    %36 = arith.maximumf %34, %35 : vector<186x31xf32>
    %cst_15 = arith.constant 1.000000e+00 : f32
    %37 = vector.broadcast %cst_15 : f32 to vector<186x31xf32>
    %38 = arith.mulf %34, %37 : vector<186x31xf32>
    %39 = arith.subf %36, %38 : vector<186x31xf32>
    %40 = math.absf %34 : vector<186x31xf32>
    %cst_16 = arith.constant 0.000000e+00 : f32
    %41 = vector.broadcast %cst_16 : f32 to vector<186x31xf32>
    %42 = arith.subf %41, %40 : vector<186x31xf32>
    %43 = math.exp %42 : vector<186x31xf32>
    %44 = math.log1p %43 : vector<186x31xf32>
    %45 = arith.addf %39, %44 : vector<186x31xf32>
    %46 = vector.shape_cast %45 : vector<186x31xf32> to vector<1x186x31xf32>
    %cst_17 = arith.constant dense<0.000000e+00> : vector<1xf32>
    %47 = vector.multi_reduction <add>, %46, %cst_17 [1, 2] : vector<1x186x31xf32> to vector<1xf32>
    %48 = vector.shape_cast %47 : vector<1xf32> to vector<1x1x1xf32>
    %49 = vector.extract %48[0, 0, 0] : f32 from vector<1x1x1xf32>
    %cst_18 = arith.constant 1.73430453E-4 : f32
    %50 = arith.mulf %49, %cst_18 : f32
    %c0_19 = arith.constant 0 : index
    %c0_20 = arith.constant 0 : index
    %51 = vector.load %arg3[%c0_19, %c0_20] : memref<192x32xf32, #tpu.memory_space<vmem>>, vector<192x32xf32>
    %c0_21 = arith.constant 0 : index
    %c0_22 = arith.constant 0 : index
    %52 = vector.load %arg4[%c0_21, %c0_22] : memref<192x32xf32, #tpu.memory_space<vmem>>, vector<192x32xf32>
    %53 = arith.subf %51, %52 : vector<192x32xf32>
    %54 = math.absf %53 : vector<192x32xf32>
    %55 = vector.shape_cast %54 : vector<192x32xf32> to vector<1x192x32xf32>
    %cst_23 = arith.constant dense<0.000000e+00> : vector<1xf32>
    %56 = vector.multi_reduction <add>, %55, %cst_23 [1, 2] : vector<1x192x32xf32> to vector<1xf32>
    %57 = vector.shape_cast %56 : vector<1xf32> to vector<1x1x1xf32>
    %58 = vector.extract %57[0, 0, 0] : f32 from vector<1x1x1xf32>
    %cst_24 = arith.constant 1.62760422E-4 : f32
    %59 = arith.mulf %58, %cst_24 : f32
    %cst_25 = arith.constant 1.000000e+02 : f32
    %60 = arith.mulf %59, %cst_25 : f32
    %61 = arith.addf %50, %60 : f32
    %c0_26 = arith.constant 0 : index
    %62 = memref.load %arg5[%c0_26] : memref<2xf32, #tpu.memory_space<smem>>
    memref.store %61, %arg5[%c0_26] : memref<2xf32, #tpu.memory_space<smem>>
    %63 = arith.addf %16, %33 : f32
    %cst_27 = arith.constant 5.000000e-01 : f32
    %64 = arith.mulf %63, %cst_27 : f32
    %c1 = arith.constant 1 : index
    %65 = memref.load %arg5[%c1] : memref<2xf32, #tpu.memory_space<smem>>
    memref.store %64, %arg5[%c1] : memref<2xf32, #tpu.memory_space<smem>>
    return
  }
}

</mosaic_0001>

<bundles_post_ra>
// kernel: _lambda_.1
= control target key start
LH: loop header
LB: loop body
LE: loop exit
PB: predicated region body
PF: predicated region fallthrough
CT: control target
= control target key end

     0   :  { %s4393_s0 = inlined_call_operand.vmem [shape: f32[186,31], index: 0, kind: input, shape index: {}, may-alias: {0,2}]   ;;  %s4394_s1 = inlined_call_operand.vmem [shape: f32[186,31], index: 1, kind: input, shape index: {}]   ;;  %s4395_s2 = inlined_call_operand.vmem [shape: f32[186,31], index: 2, kind: input, shape index: {}, may-alias: {0,2}]   ;;  %s4396_s3 = inlined_call_operand.vmem [shape: f32[192,32], index: 3, kind: input, shape index: {}]   ;;  %s4397_s4 = inlined_call_operand.vmem [shape: f32[192,32], index: 4, kind: input, shape index: {}]   ;;  %s4398_s5 = inlined_call_operand.vmem [shape: f32[2], index: 5, kind: output, shape index: {}]  }
   0x1   :  { %v1964_v0 = vld [vmem:[%s4395_s2] sm:$0xff] }
   0x2   :  { %10 = vsyncpa [#allocation3], 0  ;;  %v1969_v1 = vld [vmem:[%s4395_s2 + $0x8] sm:$0xff]  ;;  %v1001_v2 = vmax.f32 %v1964_v0, 0.0  ;;  %v1975_v3 = vld [vmem:[%s4395_s2 + $0x10] sm:$0xff]  ;;  %vm453_vm12 = vcmask 252928  }
   0x3   :  { %v1002_v4 = vmax.f32 %v1969_v1, 0.0  ;;  %v1981_v5 = vld [vmem:[%s4395_s2 + $0x18] sm:$0xff]  ;;  %v1986_v6 = vld [vmem:[%s4395_s2 + $0x20] sm:$0xff]  ;;  %v1991_v7 = vld [vmem:[%s4395_s2 + $0x28] sm:$0xff]  ;;  %v1003_v8 = vmax.f32 %v1975_v3, 0.0  ;;  %s1610_s22 = sshll.u32 %s4398_s5, 4  ;;  %s1611_s22 = int_to_ptr.vmem [resolvable:$true] %s1610_s22 }
   0x4   :  { %v1997_v9 = vld [vmem:[%s4395_s2 + $0x30] sm:$0xff]  ;;  %v2002_v10 = vld [vmem:[%s4395_s2 + $0x38] sm:$0xff]  ;;  %v2007_v11 = vld [vmem:[%s4395_s2 + $0x40] sm:$0xff]  ;;  %v1004_v12 = vmax.f32 %v1981_v5, 0.0  ;;  %v1005_v13 = vmax.f32 %v1986_v6, 0.0  ;;  %v1006_v14 = vmax.f32 %v1991_v7, 0.0  ;;  %v2031_v21 = vsub.f32 %v1001_v2, %v1964_v0  ;;  %p1921_p1 = scmp.lt.s32.totalorder %s1611_s22, %s1611_s22 }
   0x5   :  { %v2015_v15 = vld [vmem:[%s4395_s2 + $0x48] sm:$0xff]  ;;  %v2020_v16 = vld [vmem:[%s4395_s2 + $0x50] sm:$0xff]  ;;  %v2025_v17 = vld [vmem:[%s4395_s2 + $0x58] sm:$0xff]  ;;  %v1007_v18 = vmax.f32 %v1997_v9, 0.0  ;;  %v1008_v19 = vmax.f32 %v2002_v10, 0.0  ;;  %v1009_v20 = vmax.f32 %v2007_v11, 0.0  ;;  %v2052_v28 = vsub.f32 %v1002_v4, %v1969_v1 }
   0x6   :  { %v2036_v22 = vld [vmem:[%s4395_s2 + $0x60] sm:$0xff]  ;;  %v2041_v23 = vld [vmem:[%s4395_s2 + $0x68] sm:$0xff]  ;;  %v2046_v24 = vld [vmem:[%s4395_s2 + $0x70] sm:$0xff]  ;;  %v1010_v25 = vmax.f32 %v2015_v15, 0.0  ;;  %v1011_v26 = vmax.f32 %v2020_v16, 0.0  ;;  %v1012_v27 = vmax.f32 %v2025_v17, 0.0  ;;  %v2073_v35 = vsub.f32 %v1003_v8, %v1975_v3 }
   0x7   :  { %v2057_v29 = vld [vmem:[%s4395_s2 + $0x78] sm:$0xff]  ;;  %v2062_v30 = vld [vmem:[%s4395_s2 + $0x80] sm:$0xff]  ;;  %v2067_v31 = vld [vmem:[%s4395_s2 + $0x88] sm:$0xff]  ;;  %v1013_v32 = vmax.f32 %v2036_v22, 0.0  ;;  %v1014_v33 = vmax.f32 %v2041_v23, 0.0  ;;  %v1015_v34 = vmax.f32 %v2046_v24, 0.0  ;;  %v2094_v42 = vsub.f32 %v1004_v12, %v1981_v5 }
   0x8   :  { %v2078_v36 = vld [vmem:[%s4395_s2 + $0x90] sm:$0xff]  ;;  %v2083_v37 = vld [vmem:[%s4395_s2 + $0x98] sm:$0xff]  ;;  %v2088_v38 = vld [vmem:[%s4395_s2 + $0xa0] sm:$0xff]  ;;  %v1016_v39 = vmax.f32 %v2057_v29, 0.0  ;;  %v1017_v40 = vmax.f32 %v2062_v30, 0.0  ;;  %v1018_v41 = vmax.f32 %v2067_v31, 0.0  ;;  %v2109_v47 = vsub.f32 %v1005_v13, %v1986_v6 }
   0x9   :  { %v2099_v43 = vld [vmem:[%s4395_s2 + $0xa8] sm:$0xff]  ;;  %v2104_v44 = vld [vmem:[%s4395_s2 + $0xb0] sm:$0xff]  ;;  %v1019_v45 = vmax.f32 %v2078_v36, 0.0  ;;  %v1020_v46 = vmax.f32 %v2083_v37, 0.0  ;;  %v1049_v48 = vand.u32 2147483647, %v1964_v0  ;;  %v2120_v52 = vsub.f32 %v1006_v14, %v1991_v7 }
   0xa   :  { %v2115_v49 = vld [vmem:[%s4395_s2 + $0xb8] sm:$0x3]  ;;  %v1021_v50 = vmax.f32 %v2088_v38, 0.0  ;;  %v1022_v51 = vmax.f32 %v2099_v43, 0.0  ;;  %v1050_v53 = vand.u32 2147483647, %v1969_v1  ;;  %v2126_v56 = vsub.f32 %v1007_v18, %v1997_v9 }
   0xb   :  { %v1023_v54 = vmax.f32 %v2104_v44, 0.0  ;;  %v1024_v55 = vmax.f32 %v2115_v49, 0.0  ;;  %v1051_v57 = vand.u32 2147483647, %v1975_v3  ;;  %v2130_v58 = vsub.f32 %v1008_v19, %v2002_v10  ;;  %s1916_s27 = scalar_lea.vmem %s1611_s22, 16 }
   0xc   :  { %v2133_v59 = vsub.f32 %v1009_v20, %v2007_v11  ;;  %v2136_v60 = vsub.f32 %v1010_v25, %v2015_v15  ;;  %v1052_v61 = vand.u32 2147483647, %v1981_v5  ;;  %v2140_v62 = vsub.f32 %v1011_v26, %v2020_v16  ;;  %p1917_p0 = scmp.ne.s32.totalorder %s1611_s22, %s1916_s27  ;;  %p1922_p2 = scmp.lt.s32.totalorder %s1916_s27, %s1916_s27 }
   0xd   :  { %4448 = vst [vmem:[#allocation5_spill] sm:$0xff] %v2130_v58  ;;  %v2143_v63 = vsub.f32 %v1012_v27, %v2025_v17  ;;  %v1053_v0 = vand.u32 2147483647, %v1986_v6  ;;  %v1073_v1 = vsub.f32 0.0, %v1049_v48  ;;  %v2147_v2 = vsub.f32 %v1013_v32, %v2036_v22 }
   0xe   :  { %4449 = vst [vmem:[#allocation6_spill] sm:$0xff] %v2133_v59  ;;  %4450 = vst [vmem:[#allocation7_spill] sm:$0xff] %v2136_v60  ;;  %v2150_v3 = vsub.f32 %v1014_v33, %v2041_v23  ;;  %v1054_v4 = vand.u32 2147483647, %v1991_v7  ;;  %v1074_v8 = vsub.f32 0.0, %v1050_v53  ;;  %v2154_v5 = vsub.f32 %v1015_v34, %v2046_v24  ;;  %p1923_p3 = por %p1922_p2, %p1921_p1 }
   0xf   :  { %4451 = vst [vmem:[#allocation8_spill] sm:$0xff] %v2140_v62  ;;  %4452 = vst [vmem:[#allocation9_spill] sm:$0xff] %v2143_v63  ;;  %v1055_v12 = vand.u32 2147483647, %v1997_v9  ;;  %v1056_v13 = vand.u32 2147483647, %v2002_v10  ;;  %v2159_v6 = vsub.f32 %v1016_v39, %v2057_v29  ;;  %v2164_v25 = vsub.f32 %v1017_v40, %v2062_v30 }
  0x10   :  { %4453 = vst [vmem:[#allocation10_spill] sm:$0xff] %v2147_v2  ;;  %4454 = vst [vmem:[#allocation11_spill] sm:$0xff] %v2150_v3  ;;  %v1075_v14 = vsub.f32 0.0, %v1051_v57  ;;  %v1057_v18 = vand.u32 2147483647, %v2007_v11  ;;  %v1076_v20 = vsub.f32 0.0, %v1052_v61  ;;  %v2168_v9 = vsub.f32 %v1018_v41, %v2067_v31  ;;  %p1924_p4 = pnand %p1923_p3, %p1917_p0 }
  0x11   :  { %4455 = vst [vmem:[#allocation12_spill] sm:$0xff] %v2154_v5  ;;  %4456 = vst [vmem:[#allocation13_spill] sm:$0xff] %v2159_v6  ;;  %v1058_v19 = vand.u32 2147483647, %v2015_v15  ;;  %v1059_v7 = vand.u32 2147483647, %v2020_v16  ;;  %v2172_v34 = vsub.f32 %v1019_v45, %v2078_v36  ;;  %v2176_v40 = vsub.f32 %v1020_v46, %v2083_v37 }
  0x12   :  { %4457 = vst [vmem:[#allocation14_spill] sm:$0xff] %v2164_v25  ;;  %v1077_v26 = vsub.f32 0.0, %v1053_v0  ;;  %v1097_v27 = vmul.f32 1.442695, %v1073_v1  ;;  %4458 = vst [vmem:[#allocation15_spill] sm:$0xff] %v2168_v9  ;;  %v1078_v32 = vsub.f32 0.0, %v1054_v4 }
  0x13   :  { %v1060_v10 = vand.u32 2147483647, %v2025_v17  ;;  %v1099_v33 = vmul.f32 1.442695, %v1074_v8  ;;  %4459 = vst [vmem:[#allocation16_spill] sm:$0xff] %v2172_v34  ;;  %v1079_v15 = vsub.f32 0.0, %v1055_v12 }
  0x14   :  { %v1061_v11 = vand.u32 2147483647, %v2036_v22  ;;  %v1101_v39 = vmul.f32 1.442695, %v1075_v14  ;;  %4460 = vst [vmem:[#allocation17_spill] sm:$0xff] %v2176_v40  ;;  %v1080_v48 = vsub.f32 0.0, %v1056_v13  ;;  %1628 = vpow2.f32 %v1097_v27 }
  0x15   :  { %v1062_v16 = vand.u32 2147483647, %v2041_v23  ;;  %v1103_v53 = vmul.f32 1.442695, %v1076_v20  ;;  %v1063_v41 = vand.u32 2147483647, %v2046_v24  ;;  %1630 = vpow2.f32 %v1099_v33 }
  0x16   :  { %v1081_v57 = vsub.f32 0.0, %v1057_v18  ;;  %v1105_v17 = vmul.f32 1.442695, %v1077_v26  ;;  %v1064_v61 = vand.u32 2147483647, %v2057_v29  ;;  %v1082_v45 = vsub.f32 0.0, %v1058_v19 }
  0x17   :  { %v1107_v0 = vmul.f32 1.442695, %v1078_v32  ;;  %v1065_v22 = vand.u32 2147483647, %v2062_v30  ;;  %v1083_v1 = vsub.f32 0.0, %v1059_v7  ;;  %1632 = vpow2.f32 %v1101_v39 }
  0x18   :  { %v1109_v46 = vmul.f32 1.442695, %v1079_v15  ;;  %v1066_v4 = vand.u32 2147483647, %v2067_v31  ;;  %v1084_v23 = vsub.f32 0.0, %v1060_v10  ;;  %1634 = vpow2.f32 %v1103_v53 }
  0x19   :  { %v1111_v8 = vmul.f32 1.442695, %v1080_v48  ;;  %v1067_v24 = vand.u32 2147483647, %v2078_v36  ;;  %v1085_v12 = vsub.f32 0.0, %v1061_v11  ;;  %1636 = vpow2.f32 %v1105_v17 }
  0x1a   :  { %v1113_v13 = vmul.f32 1.442695, %v1081_v57  ;;  %v1068_v29 = vand.u32 2147483647, %v2083_v37  ;;  %v1086_v14 = vsub.f32 0.0, %v1062_v16  ;;  %1638 = vpow2.f32 %v1107_v0 }
  0x1b   :  { %v1115_v18 = vmul.f32 1.442695, %v1082_v45  ;;  %v1069_v30 = vand.u32 2147483647, %v2088_v38  ;;  %v1087_v19 = vsub.f32 0.0, %v1063_v41  ;;  %1640 = vpow2.f32 %v1109_v46 }
  0x1c   :  { %v1117_v20 = vmul.f32 1.442695, %v1083_v1  ;;  %v1070_v31 = vand.u32 2147483647, %v2099_v43  ;;  %v1088_v7 = vsub.f32 0.0, %v1064_v61  ;;  %1642 = vpow2.f32 %v1111_v8 }
  0x1d   :  { %v1119_v26 = vmul.f32 1.442695, %v1084_v23  ;;  %v1071_v36 = vand.u32 2147483647, %v2104_v44  ;;  %v1089_v27 = vsub.f32 0.0, %v1065_v22  ;;  %1644 = vpow2.f32 %v1113_v13  ;;  %v2218_v23 = vld [vmem:[%s4393_s0] sm:$0xff] }
  0x1e   :  { %v1121_v10 = vmul.f32 1.442695, %v1085_v12  ;;  %v1072_v37 = vand.u32 2147483647, %v2115_v49  ;;  %v1090_v32 = vsub.f32 0.0, %v1066_v4  ;;  %1646 = vpow2.f32 %v1115_v18  ;;  %v2189_v11 = vpop.eup %1628  ;;  %4464 = vst [vmem:[#allocation21_spill] sm:$0xff] %v2218_v23 }
  0x1f   :  { %v1123_v33 = vmul.f32 1.442695, %v1086_v14  ;;  %v2194_v15 = vsub.f32 %v1021_v50, %v2088_v38  ;;  %v1091_v39 = vsub.f32 0.0, %v1067_v24  ;;  %1648 = vpow2.f32 %v1117_v20  ;;  %v2196_v48 = vpop.eup %1630  ;;  %v2234_v18 = vld [vmem:[%s4393_s0 + $0x8] sm:$0xff] }
  0x20   :  { %v1125_v16 = vmul.f32 1.442695, %v1087_v19  ;;  %v2201_v53 = vsub.f32 %v1022_v51, %v2099_v43  ;;  %v1092_v41 = vsub.f32 0.0, %v1068_v29  ;;  %1650 = vpow2.f32 %v1119_v26  ;;  %4466 = vst [vmem:[#allocation23_spill] sm:$0xff] %v2234_v18  ;;  %v2241_v19 = vld [vmem:[%s4393_s0 + $0x10] sm:$0xff] }
  0x21   :  { %4461 = vst [vmem:[#allocation18_spill] sm:$0xff] %v2194_v15  ;;  %v1127_v57 = vmul.f32 1.442695, %v1088_v7  ;;  %v2203_v17 = vpop.eup %1632  ;;  %v1093_v61 = vsub.f32 0.0, %v1069_v30  ;;  %v1094_v45 = vsub.f32 0.0, %v1070_v31  ;;  %1652 = vpow2.f32 %v1121_v10  ;;  %4467 = vst [vmem:[#allocation24_spill] sm:$0xff] %v2241_v19 }
  0x22   :  { %4462 = vst [vmem:[#allocation19_spill] sm:$0xff] %v2201_v53  ;;  %v1129_v38 = vmul.f32 1.442695, %v1089_v27  ;;  %v2205_v50 = vpop.eup %1634  ;;  %v1095_v0 = vsub.f32 0.0, %v1071_v36  ;;  %v1096_v22 = vsub.f32 0.0, %v1072_v37  ;;  %1654 = vpow2.f32 %v1123_v33  ;;  %v2250_v36 = vld [vmem:[%s4393_s0 + $0x18] sm:$0xff] }
  0x23   :  { %v1131_v1 = vmul.f32 1.442695, %v1090_v32  ;;  %v2207_v46 = vpop.eup %1636  ;;  %v2212_v43 = vsub.f32 %v1023_v54, %v2104_v44  ;;  %1656 = vpow2.f32 %v1125_v16  ;;  %v1133_v51 = vmul.f32 1.442695, %v1091_v39  ;;  %4468 = vst [vmem:[#allocation25_spill] sm:$0xff] %v2250_v36  ;;  %v2255_v27 = vld [vmem:[%s4393_s0 + $0x20] sm:$0xff] }
  0x24   :  { %v1148_v4 = vmul.f32 -0.5, %v2189_v11  ;;  %v2220_v8 = vpop.eup %1638  ;;  %v2225_v24 = vsub.f32 %v1024_v55, %v2115_v49  ;;  %1658 = vpow2.f32 %v1127_v57  ;;  %v1135_v12 = vmul.f32 1.442695, %v1092_v41  ;;  %4469 = vst [vmem:[#allocation26_spill] sm:$0xff] %v2255_v27 }
  0x25   :  { %4463 = vst [vmem:[#allocation20_spill] sm:$0xff] %v2212_v43  ;;  %v2228_v54 = vpop.eup %1640  ;;  %1660 = vpow2.f32 %v1129_v38  ;;  %v1137_v13 = vmul.f32 1.442695, %v1093_v61  ;;  %v1139_v29 = vmul.f32 1.442695, %v1094_v45  ;;  %v1157_v14 = vmul.f32 -0.5, %v2196_v48 }
  0x26   :  { %4465 = vst [vmem:[#allocation22_spill] sm:$0xff] %v2225_v24  ;;  %v2236_v30 = vpop.eup %1642  ;;  %1662 = vpow2.f32 %v1131_v1  ;;  %v1141_v49 = vmul.f32 1.442695, %v1095_v0  ;;  %v1143_v55 = vmul.f32 1.442695, %v1096_v22  ;;  %v1149_v7 = vadd.f32 1.0, %v1148_v4 }
  0x27   :  { %v2244_v31 = vpop.eup %1644  ;;  %1664 = vpow2.f32 %v1133_v51  ;;  %v1166_v26 = vmul.f32 -0.5, %v2203_v17  ;;  %v1175_v32 = vmul.f32 -0.5, %v2205_v50  ;;  %v1145_v41 = vadd.f32 1.0, %v2189_v11 }
  0x28   :  { %v2258_v37 = vpop.eup %1646  ;;  %1666 = vpow2.f32 %v1135_v12  ;;  %v1151_v57 = vand.u32 2147483647, %v2189_v11  ;;  %v1158_v61 = vadd.f32 1.0, %v1157_v14  ;;  %v1154_v38 = vadd.f32 1.0, %v2196_v48 }
  0x29   :  { %v2263_v16 = vpop.eup %1648  ;;  %1668 = vpow2.f32 %v1137_v13  ;;  %v1160_v0 = vand.u32 2147483647, %v2196_v48  ;;  %v1184_v22 = vmul.f32 -0.5, %v2207_v46  ;;  %v2275_v51 = vmul.f32 %v2189_v11, %v1149_v7 }
  0x2a   :  { %v2267_v45 = vpop.eup %1650  ;;  %1670 = vpow2.f32 %v1139_v29  ;;  %v1163_v4 = vadd.f32 1.0, %v2203_v17  ;;  %v1167_v12 = vadd.f32 1.0, %v1166_v26  ;;  %v1169_v29 = vand.u32 2147483647, %v2203_v17 }
  0x2b   :  { %v2272_v1 = vpop.eup %1652  ;;  %1672 = vpow2.f32 %v1141_v49  ;;  %v1172_v14 = vadd.f32 1.0, %v2205_v50  ;;  %v1176_v39 = vadd.f32 1.0, %v1175_v32  ;;  %v2285_v10 = vmul.f32 %v2196_v48, %v1158_v61 }
  0x2c   :  { %v2278_v13 = vpop.eup %1654  ;;  %1674 = vpow2.f32 %v1143_v55  ;;  %v1181_v11 = vadd.f32 1.0, %v2207_v46  ;;  %v1193_v49 = vmul.f32 -0.5, %v2220_v8  ;;  %v1178_v55 = vand.u32 2147483647, %v2205_v50 }
  0x2d   :  { %v2282_v33 = vpop.eup %1656  ;;  %1676 = vlog2.f32 %v1145_v41  ;;  %v1185_v26 = vadd.f32 1.0, %v1184_v22  ;;  %v1190_v20 = vadd.f32 1.0, %v2220_v8  ;;  %v2296_v32 = vmul.f32 %v2203_v17, %v1167_v12 }
  0x2e   :  { %v2289_v7 = vpop.eup %1658  ;;  %1678 = vlog2.f32 %v1154_v38  ;;  %v1199_v48 = vadd.f32 1.0, %v2228_v54  ;;  %v1202_v41 = vmul.f32 -0.5, %v2228_v54  ;;  %v2303_v38 = vmul.f32 %v2205_v50, %v1176_v39 }
  0x2f   :  { %v2293_v44 = vpop.eup %1660  ;;  %1680 = vlog2.f32 %v1163_v4  ;;  %v1187_v22 = vand.u32 2147483647, %v2207_v46  ;;  %v1208_v27 = vadd.f32 1.0, %v2236_v30  ;;  %v1194_v4 = vadd.f32 1.0, %v1193_v49 }
  0x30   :  { %v2300_v61 = vpop.eup %1662  ;;  %1682 = vlog2.f32 %v1172_v14  ;;  %v1196_v17 = vand.u32 2147483647, %v2220_v8  ;;  %v1217_v12 = vadd.f32 1.0, %v2244_v31  ;;  %v2314_v18 = vmul.f32 %v2207_v46, %v1185_v26 }
  0x31   :  { %v2307_v36 = vpop.eup %1664  ;;  %1684 = vlog2.f32 %v1181_v11  ;;  %v1211_v50 = vmul.f32 -0.5, %v2236_v30  ;;  %v1226_v39 = vadd.f32 1.0, %v2258_v37  ;;  %v1203_v23 = vadd.f32 1.0, %v1202_v41 }
  0x32   :  { %v2311_v19 = vpop.eup %1666  ;;  %1686 = vlog2.f32 %v1190_v20  ;;  %v1220_v11 = vmul.f32 -0.5, %v2244_v31  ;;  %v1235_v49 = vadd.f32 1.0, %v2263_v16  ;;  %vm2324_vm0 = vcmp.lt.f32.partialorder %v1151_v57, 0.0004427343 }
  0x33   :  { %v2318_v14 = vpop.eup %1668  ;;  %1688 = vlog2.f32 %v1199_v48  ;;  %v1205_v46 = vand.u32 2147483647, %v2228_v54  ;;  %v1229_v20 = vmul.f32 -0.5, %v2258_v37  ;;  %v1244_v26 = vadd.f32 1.0, %v2267_v45 }
  0x34   :  { %v2322_v24 = vpop.eup %1670  ;;  %1690 = vlog2.f32 %v1208_v27  ;;  %vm2333_vm1 = vcmp.lt.f32.partialorder %v1160_v0, 0.0004427343  ;;  %v2338_v41 = vmul.f32 %v2220_v8, %v1194_v4  ;;  %v1238_v57 = vmul.f32 -0.5, %v2263_v16 }
  0x35   :  { %v2331_v53 = vpop.eup %1672  ;;  %1692 = vlog2.f32 %v1217_v12  ;;  %v1253_v15 = vadd.f32 1.0, %v2272_v1  ;;  %vm2344_vm2 = vcmp.lt.f32.partialorder %v1169_v29, 0.0004427343  ;;  %v1212_v34 = vadd.f32 1.0, %v1211_v50 }
  0x36   :  { %v2342_v40 = vpop.eup %1674  ;;  %v1214_v0 = vand.u32 2147483647, %v2236_v30  ;;  %1694 = vlog2.f32 %v1226_v39  ;;  %v1247_v9 = vmul.f32 -0.5, %v2267_v45  ;;  %vm2350_vm3 = vcmp.lt.f32.partialorder %v1178_v55, 0.0004427343 }
  0x37   :  { %4474 = vst [vmem:[#allocation27_spill] sm:$0xff] %v2342_v40  ;;  %v1677_v25 = vpop.eup %1676  ;;  %vm2354_vm4 = vcmp.lt.f32.partialorder %v1187_v22, 0.0004427343  ;;  %v2359_v29 = vmul.f32 %v2228_v54, %v1203_v23  ;;  %v1221_v12 = vadd.f32 1.0, %v1220_v11  ;;  %v1223_v50 = vand.u32 2147483647, %v2244_v31 }
  0x38   :  { %1696 = vlog2.f32 %v1235_v49  ;;  %v1679_v6 = vpop.eup %1678  ;;  %vm2362_vm5 = vcmp.lt.f32.partialorder %v1196_v17, 0.0004427343  ;;  %v1230_v55 = vadd.f32 1.0, %v1229_v20  ;;  %v1232_v5 = vand.u32 2147483647, %v2258_v37 }
  0x39   :  { %v1241_v22 = vand.u32 2147483647, %v2263_v16  ;;  %1698 = vlog2.f32 %v1244_v26  ;;  %v1681_v3 = vpop.eup %1680  ;;  %vm2368_vm6 = vcmp.lt.f32.partialorder %v1205_v46, 0.0004427343  ;;  %v1239_v23 = vadd.f32 1.0, %v1238_v57 }
  0x3a   :  { %1700 = vlog2.f32 %v1253_v15  ;;  %v1256_v54 = vmul.f32 -0.5, %v2272_v1  ;;  %v1262_v17 = vadd.f32 1.0, %v2278_v13  ;;  %v1683_v11 = vpop.eup %1682  ;;  %v2375_v49 = vmul.f32 %v2236_v30, %v1212_v34 }
  0x3b   :  { %vm2377_vm7 = vcmp.lt.f32.partialorder %v1214_v0, 0.0004427343  ;;  %v1248_v26 = vadd.f32 1.0, %v1247_v9  ;;  %v1250_v46 = vand.u32 2147483647, %v2267_v45  ;;  %v1685_v63 = vpop.eup %1684  ;;  %v2385_v15 = vmul.f32 %v2244_v31, %v1221_v12  ;;  %v4511_v9 = vld [vmem:[#allocation8_spill] sm:$0xff] }
  0x3c   :  { %v2382_v62 = vmul.f32 0.6931472, %v1677_v25  ;;  %vm2387_vm8 = vcmp.lt.f32.partialorder %v1223_v50, 0.0004427343  ;;  %v1265_v34 = vmul.f32 -0.5, %v2278_v13  ;;  %v1687_v30 = vpop.eup %1686  ;;  %v2393_v60 = vmul.f32 %v2258_v37, %v1230_v55 }
  0x3d   :  { %v1156_v0 = vmul.f32 0.6931472, %v1679_v6  ;;  %vm2395_vm9 = vcmp.lt.f32.partialorder %v1232_v5, 0.0004427343  ;;  %v1259_v25 = vand.u32 2147483647, %v2272_v1  ;;  %v1689_v59 = vpop.eup %1688  ;;  %v2401_v12 = vmul.f32 %v2263_v16, %v1239_v23 }
  0x3e   :  { %v1165_v31 = vmul.f32 0.6931472, %v1681_v3  ;;  %vm2403_vm10 = vcmp.lt.f32.partialorder %v1241_v22, 0.0004427343  ;;  %v1257_v58 = vadd.f32 1.0, %v1256_v54  ;;  %1702 = vlog2.f32 %v1262_v17  ;;  %v1691_v6 = vpop.eup %1690 }
  0x3f   :  { %v1174_v37 = vmul.f32 0.6931472, %v1683_v11  ;;  %v2407_v55 = vmul.f32 0.6931472, %v1685_v63  ;;  %v2410_v5 = vmul.f32 %v2267_v45, %v1248_v26  ;;  %vm2412_vm11 = vcmp.lt.f32.partialorder %v1250_v46, 0.0004427343  ;;  %v1693_v16 = vpop.eup %1692 }
  0x40   :  { %v1274_v3 = vmul.f32 -0.5, %v2282_v33  ;;  %v1153_v22 = vsel %vm2324_vm0, %v2275_v51, %v2382_v62  ;;  %v2421_v23 = vmul.f32 0.6931472, %v1687_v30  ;;  %v1266_v54 = vadd.f32 1.0, %v1265_v34  ;;  %v1695_v17 = vpop.eup %1694 }
  0x41   :  { %v1268_v63 = vand.u32 2147483647, %v2278_v13  ;;  %v1162_v45 = vsel %vm2333_vm1, %v2285_v10, %v1156_v0  ;;  %v2427_v11 = vmul.f32 0.6931472, %v1689_v59  ;;  %vm2429_vm13 = vcmp.lt.f32.partialorder %v1259_v25, 0.0004427343 }
  0x42   :  { %v1271_v43 = vadd.f32 1.0, %v2282_v33  ;;  %v1697_v62 = vpop.eup %1696  ;;  %v1171_v51 = vsel %vm2344_vm2, %v2296_v32, %v1165_v31  ;;  %v2437_v46 = vmul.f32 0.6931472, %v1691_v6  ;;  %v2440_v34 = vmul.f32 %v2272_v1, %v1257_v58 }
  0x43   :  { %v1283_v10 = vmul.f32 -0.5, %v2289_v7  ;;  %v1699_v59 = vpop.eup %1698  ;;  %v1180_v48 = vsel %vm2350_vm3, %v2303_v38, %v1174_v37  ;;  %v1189_v30 = vsel %vm2354_vm4, %v2314_v18, %v2407_v55  ;;  %v2450_v0 = vmul.f32 0.6931472, %v1693_v16 }
  0x44   :  { %v1275_v32 = vadd.f32 1.0, %v1274_v3  ;;  %v1701_v27 = vpop.eup %1700  ;;  %v1198_v58 = vsel %vm2362_vm5, %v2338_v41, %v2421_v23  ;;  %v2456_v1 = vmul.f32 0.6931472, %v1695_v17  ;;  %v2459_v25 = vmul.f32 %v2278_v13, %v1266_v54 }
  0x45   :  { %vm2461_vm14 = vcmp.lt.f32.partialorder %v1268_v63, 0.0004427343  ;;  %v1207_v18 = vsel %vm2368_vm6, %v2359_v29, %v2427_v11  ;;  %v2469_v8 = vmul.f32 0.6931472, %v1697_v62  ;;  %1704 = vlog2.f32 %v1271_v43 }
  0x46   :  { %v1280_v4 = vadd.f32 1.0, %v2289_v7  ;;  %v1216_v13 = vsel %vm2377_vm7, %v2375_v49, %v2437_v46  ;;  %v2476_v41 = vmul.f32 0.6931472, %v1699_v59  ;;  %v1277_v39 = vand.u32 2147483647, %v2282_v33 }
  0x47   :  { %v1284_v31 = vadd.f32 1.0, %v1283_v10  ;;  %v1225_v2 = vsel %vm2387_vm8, %v2385_v15, %v2450_v0  ;;  %v2483_v29 = vmul.f32 0.6931472, %v1701_v27  ;;  %v2486_v6 = vmul.f32 %v2282_v33, %v1275_v32 }
  0x48   :  { %v1289_v37 = vadd.f32 1.0, %v2293_v44  ;;  %v1703_v55 = vpop.eup %1702  ;;  %v1234_v49 = vsel %vm2395_vm9, %v2393_v60, %v2456_v1  ;;  %v1292_v20 = vmul.f32 -0.5, %v2293_v44  ;;  %v1298_v3 = vadd.f32 1.0, %v2300_v61 }
  0x49   :  { %v1361_v16 = vadd.f32 %v1153_v22, %v2031_v21  ;;  %v1243_v33 = vsel %vm2403_vm10, %v2401_v12, %v2469_v8  ;;  %1706 = vlog2.f32 %v1280_v4  ;;  %v1362_v23 = vadd.f32 %v1162_v45, %v2052_v28  ;;  %v2701_v12 = vld [vmem:[%s4393_s0 + $0x38] sm:$0xff] }
  0x4a   :  { %v1363_v54 = vadd.f32 %v1171_v51, %v2073_v35  ;;  %v1252_v63 = vsel %vm2412_vm11, %v2410_v5, %v2476_v41  ;;  %v2507_v17 = vmul.f32 %v2289_v7, %v1284_v31  ;;  %v1286_v21 = vand.u32 2147483647, %v2289_v7 }
  0x4b   :  { %v1295_v22 = vand.u32 2147483647, %v2293_v44  ;;  %v1261_v11 = vsel %vm2429_vm13, %v2440_v34, %v2483_v29  ;;  %v2515_v28 = vmul.f32 0.6931472, %v1703_v55  ;;  %vm2517_vm15 = vcmp.lt.f32.partialorder %v1277_v39, 0.0004427343 }
  0x4c   :  { %1708 = vlog2.f32 %v1289_v37  ;;  %v1364_v45 = vadd.f32 %v1180_v48, %v2094_v42  ;;  %v1293_v43 = vadd.f32 1.0, %v1292_v20  ;;  %v1301_v7 = vmul.f32 -0.5, %v2300_v61 }
  0x4d   :  { %1710 = vlog2.f32 %v1298_v3  ;;  %v1385_v62 = vsel %vm453_vm12, %v1361_v16, 0.0  ;;  %v1307_v51 = vadd.f32 1.0, %v2307_v36  ;;  %v1365_v46 = vadd.f32 %v1189_v30, %v2109_v47 }
  0x4e   :  { %v1386_v10 = vsel %vm453_vm12, %v1362_v23, 0.0  ;;  %v1388_v59 = vsel %vm453_vm12, %v1363_v54, 0.0  ;;  %v1304_v32 = vand.u32 2147483647, %v2300_v61  ;;  %v1310_v27 = vmul.f32 -0.5, %v2307_v36 }
  0x4f   :  { %v1316_v42 = vadd.f32 1.0, %v2311_v19  ;;  %v1387_v48 = vadd.f32 %v1386_v10, %v1385_v62  ;;  %v1705_v4 = vpop.eup %1704  ;;  %v1270_v39 = vsel %vm2461_vm14, %v2459_v25, %v2515_v28  ;;  %v1325_v31 = vadd.f32 1.0, %v2318_v14 }
  0x50   :  { %v1366_v47 = vadd.f32 %v1198_v58, %v2120_v52  ;;  %v1390_v30 = vsel %vm453_vm12, %v1364_v45, 0.0  ;;  %v2539_v37 = vmul.f32 %v2293_v44, %v1293_v43  ;;  %v1302_v55 = vadd.f32 1.0, %v1301_v7  ;;  %v4503_v44 = vld [vmem:[#allocation27_spill] sm:$0xff] }
  0x51   :  { %v1334_v20 = vadd.f32 1.0, %v2322_v24  ;;  %v1389_v3 = vadd.f32 %v1388_v59, %v1387_v48  ;;  %vm2542_vm0 = vcmp.lt.f32.partialorder %v1286_v21, 0.0004427343  ;;  %1712 = vlog2.f32 %v1307_v51  ;;  %v4504_v21 = vld [vmem:[#allocation5_spill] sm:$0xff]  ;;  %v4523_v59 = vld [vmem:[#allocation12_spill] sm:$0xff] }
  0x52   :  { %v1343_v23 = vadd.f32 1.0, %v2331_v53  ;;  %v1367_v54 = vadd.f32 %v1207_v18, %v2126_v56  ;;  %v1392_v52 = vsel %vm453_vm12, %v1365_v46, 0.0  ;;  %v2549_v58 = vmul.f32 0.6931472, %v1705_v4  ;;  %v4507_v4 = vld [vmem:[#allocation6_spill] sm:$0xff] }
  0x53   :  { %1714 = vlog2.f32 %v1316_v42  ;;  %v1352_v45 = vadd.f32 1.0, %v4503_v44  ;;  %v1391_v43 = vadd.f32 %v1390_v30, %v1389_v3  ;;  %v1707_v7 = vpop.eup %1706  ;;  %v1319_v62 = vmul.f32 -0.5, %v2311_v19  ;;  %v4508_v3 = vld [vmem:[#allocation7_spill] sm:$0xff] }
  0x54   :  { %1716 = vlog2.f32 %v1325_v31  ;;  %v1368_v10 = vadd.f32 %v1216_v13, %v4504_v21  ;;  %v1394_v51 = vsel %vm453_vm12, %v1366_v47, 0.0  ;;  %vm2555_vm1 = vcmp.lt.f32.partialorder %v1295_v22, 0.0004427343 }
  0x55   :  { %v1311_v56 = vadd.f32 1.0, %v1310_v27  ;;  %v1313_v18 = vand.u32 2147483647, %v2307_v36  ;;  %1718 = vlog2.f32 %v1334_v20  ;;  %v1393_v46 = vadd.f32 %v1392_v52, %v1391_v43 }
  0x56   :  { %v1709_v42 = vpop.eup %1708  ;;  %v1328_v48 = vmul.f32 -0.5, %v2318_v14  ;;  %1720 = vlog2.f32 %v1343_v23  ;;  %v1369_v13 = vadd.f32 %v1225_v2, %v4507_v4  ;;  %v1396_v22 = vsel %vm453_vm12, %v1367_v54, 0.0 }
  0x57   :  { %v1711_v31 = vpop.eup %1710  ;;  %v1279_v27 = vsel %vm2517_vm15, %v2486_v6, %v2549_v58  ;;  %v2573_v47 = vmul.f32 %v2300_v61, %v1302_v55  ;;  %1722 = vlog2.f32 %v1352_v45  ;;  %v1395_v30 = vadd.f32 %v1394_v51, %v1393_v46  ;;  %v4519_v46 = vld [vmem:[#allocation10_spill] sm:$0xff] }
  0x58   :  { %v1320_v20 = vadd.f32 1.0, %v1319_v62  ;;  %v1322_v57 = vand.u32 2147483647, %v2311_v19  ;;  %v1370_v15 = vadd.f32 %v1234_v49, %v4508_v3  ;;  %v1398_v0 = vsel %vm453_vm12, %v1368_v10, 0.0  ;;  %v4529_v55 = vld [vmem:[#allocation14_spill] sm:$0xff] }
  0x59   :  { %v1282_v2 = vmul.f32 0.6931472, %v1707_v7  ;;  %v1331_v6 = vand.u32 2147483647, %v2318_v14  ;;  %v1337_v61 = vmul.f32 -0.5, %v2322_v24  ;;  %v1397_v35 = vadd.f32 %v1396_v22, %v1395_v30 }
  0x5a   :  { %vm2585_vm2 = vcmp.lt.f32.partialorder %v1304_v32, 0.0004427343  ;;  %v1329_v23 = vadd.f32 1.0, %v1328_v48  ;;  %v1346_v54 = vmul.f32 -0.5, %v2331_v53  ;;  %v1371_v60 = vadd.f32 %v1243_v33, %v4511_v9 }
  0x5b   :  { %v1400_v1 = vsel %vm453_vm12, %v1369_v13, 0.0  ;;  %v2598_v49 = vmul.f32 %v2307_v36, %v1311_v56  ;;  %vm2600_vm3 = vcmp.lt.f32.partialorder %v1313_v18, 0.0004427343  ;;  %v1340_v52 = vand.u32 2147483647, %v2322_v24  ;;  %v1713_v43 = vpop.eup %1712  ;;  %v4516_v36 = vld [vmem:[#allocation9_spill] sm:$0xff] }
  0x5c   :  { %v1355_v58 = vmul.f32 -0.5, %v4503_v44  ;;  %v1399_v45 = vadd.f32 %v1398_v0, %v1397_v35  ;;  %v1291_v50 = vmul.f32 0.6931472, %v1709_v42  ;;  %v2607_v7 = vmul.f32 %v2311_v19, %v1320_v20  ;;  %v4522_v13 = vld [vmem:[#allocation11_spill] sm:$0xff]  ;;  %v2789_v35 = vld [vmem:[%s4393_s0 + $0xa0] sm:$0xff] }
  0x5d   :  { %vm2609_vm4 = vcmp.lt.f32.partialorder %v1322_v57, 0.0004427343  ;;  %v1372_v8 = vadd.f32 %v1252_v63, %v4516_v36  ;;  %v1402_v33 = vsel %vm453_vm12, %v1370_v15, 0.0  ;;  %v1715_v62 = vpop.eup %1714  ;;  %v1288_v21 = vsel %vm2542_vm0, %v2507_v17, %v1282_v2  ;;  %v4535_v17 = vld [vmem:[#allocation20_spill] sm:$0xff] }
  0x5e   :  { %vm2623_vm5 = vcmp.lt.f32.partialorder %v1331_v6, 0.0004427343  ;;  %v1338_v10 = vadd.f32 1.0, %v1337_v61  ;;  %v1401_v51 = vadd.f32 %v1400_v1, %v1399_v45  ;;  %v1717_v56 = vpop.eup %1716  ;;  %v1330_v40 = vmul.f32 %v2318_v14, %v1329_v23  ;;  %v4524_v6 = vld [vmem:[#allocation13_spill] sm:$0xff]  ;;  %v2672_v23 = vld [vmem:[%s4393_s0 + $0x28] sm:$0xff] }
  0x5f   :  { %v1347_v18 = vadd.f32 1.0, %v1346_v54  ;;  %v1373_v5 = vadd.f32 %v1261_v11, %v4519_v46  ;;  %v1404_v41 = vsel %vm453_vm12, %v1371_v60, 0.0  ;;  %v1719_v63 = vpop.eup %1718  ;;  %vm2635_vm6 = vcmp.lt.f32.partialorder %v1340_v52, 0.0004427343 }
  0x60   :  { %v1349_v16 = vand.u32 2147483647, %v2331_v53  ;;  %v1356_v42 = vadd.f32 1.0, %v1355_v58  ;;  %v1403_v48 = vadd.f32 %v1402_v33, %v1401_v51  ;;  %v1721_v14 = vpop.eup %1720  ;;  %v1297_v26 = vsel %vm2555_vm1, %v2539_v37, %v1291_v50 }
  0x61   :  { %v1300_v4 = vmul.f32 0.6931472, %v1711_v31  ;;  %v1374_v34 = vadd.f32 %v1270_v39, %v4522_v13  ;;  %v1406_v29 = vsel %vm453_vm12, %v1372_v8, 0.0  ;;  %v1723_v11 = vpop.eup %1722  ;;  %v1309_v22 = vmul.f32 0.6931472, %v1713_v43  ;;  %v4530_v43 = vld [vmem:[#allocation15_spill] sm:$0xff] }
  0x62   :  { %v1339_v30 = vmul.f32 %v2322_v24, %v1338_v10  ;;  %v1358_v20 = vand.u32 2147483647, %v4503_v44  ;;  %v1405_v57 = vadd.f32 %v1404_v41, %v1403_v48  ;;  %v1318_v3 = vmul.f32 0.6931472, %v1715_v62  ;;  %v4531_v8 = vld [vmem:[#allocation16_spill] sm:$0xff]  ;;  %v4532_v10 = vld [vmem:[#allocation17_spill] sm:$0xff] }
  0x63   :  { %v1348_v37 = vmul.f32 %v2331_v53, %v1347_v18  ;;  %v1375_v31 = vadd.f32 %v1279_v27, %v4523_v59  ;;  %v1408_v38 = vsel %vm453_vm12, %v1373_v5, 0.0  ;;  %v1327_v15 = vmul.f32 0.6931472, %v1717_v56  ;;  %v4533_v56 = vld [vmem:[#allocation18_spill] sm:$0xff]  ;;  %v4534_v18 = vld [vmem:[#allocation19_spill] sm:$0xff]  ;;  %v2713_v41 = vld [vmem:[%s4393_s0 + $0x40] sm:$0xff] }
  0x64   :  { %v1336_v0 = vmul.f32 0.6931472, %v1719_v63  ;;  %v1357_v25 = vmul.f32 %v4503_v44, %v1356_v42  ;;  %v1407_v28 = vadd.f32 %v1406_v29, %v1405_v57  ;;  %vm499_vm7 = vcmask 246784   ;;  %v2718_v63 = vld [vmem:[%s4393_s0 + $0x48] sm:$0xff]  ;;  %v2735_v13 = vld [vmem:[%s4393_s0 + $0x60] sm:$0xff]  ;;  %v2784_v27 = vld [vmem:[%s4393_s0 + $0x98] sm:$0xff] }
  0x65   :  { %v1345_v39 = vmul.f32 0.6931472, %v1721_v14  ;;  %v1354_v2 = vmul.f32 0.6931472, %v1723_v11  ;;  %v1376_v24 = vadd.f32 %v1288_v21, %v4524_v6  ;;  %v1410_v61 = vsel %vm453_vm12, %v1374_v34, 0.0  ;;  %v4536_v42 = vld [vmem:[#allocation22_spill] sm:$0xff] }
  0x66   :  { %v1306_v53 = vsel %vm2585_vm2, %v2573_v47, %v1300_v4  ;;  %vm2661_vm8 = vcmp.lt.f32.partialorder %v1349_v16, 0.0004427343  ;;  %vm2665_vm9 = vcmp.lt.f32.partialorder %v1358_v20, 0.0004427343  ;;  %v1409_v44 = vadd.f32 %v1408_v38, %v1407_v28  ;;  %v2730_v4 = vld [vmem:[%s4393_s0 + $0x58] sm:$0xff]  ;;  %v2742_v11 = vld [vmem:[%s4393_s0 + $0x68] sm:$0xff] }
  0x67   :  { %v1315_v54 = vsel %vm2600_vm3, %v2598_v49, %v1309_v22  ;;  %v1377_v47 = vadd.f32 %v1297_v26, %v4529_v55  ;;  %v1412_v9 = vsel %vm453_vm12, %v1375_v31, 0.0  ;;  %v1324_v1 = vsel %vm2609_vm4, %v2607_v7, %v1318_v3  ;;  %v2696_v7 = vld [vmem:[%s4393_s0 + $0x30] sm:$0xff] }
  0x68   :  { %v1333_v52 = vsel %vm2623_vm5, %v1330_v40, %v1327_v15  ;;  %v1342_v58 = vsel %vm2635_vm6, %v1339_v30, %v1336_v0  ;;  %v1411_v45 = vadd.f32 %v1410_v61, %v1409_v44  ;;  %v1351_v49 = vsel %vm2661_vm8, %v1348_v37, %v1345_v39  ;;  %v2725_v26 = vld [vmem:[%s4393_s0 + $0x50] sm:$0xff]  ;;  %v2755_v37 = vld [vmem:[%s4393_s0 + $0x78] sm:$0xff]  ;;  %v2767_v39 = vld [vmem:[%s4393_s0 + $0x80] sm:$0xff] }
  0x69   :  { %v1360_v32 = vsel %vm2665_vm9, %v1357_v25, %v1354_v2  ;;  %v1378_v50 = vadd.f32 %v1306_v53, %v4530_v43  ;;  %v1414_v36 = vsel %vm453_vm12, %v1376_v24, 0.0  ;;  %v1379_v33 = vadd.f32 %v1315_v54, %v4531_v8  ;;  %v2747_v22 = vld [vmem:[%s4393_s0 + $0x70] sm:$0xff]  ;;  %v2772_v2 = vld [vmem:[%s4393_s0 + $0x88] sm:$0xff] }
  0x6a   :  { %v1413_v62 = vadd.f32 %v1412_v9, %v1411_v45  ;;  %v1380_v51 = vadd.f32 %v1324_v1, %v4532_v10  ;;  %v1381_v40 = vadd.f32 %v1333_v52, %v4533_v56  ;;  %v1382_v46 = vadd.f32 %v1342_v58, %v4534_v18  ;;  %v2779_v53 = vld [vmem:[%s4393_s0 + $0x90] sm:$0xff]  ;;  %v2795_v54 = vld [vmem:[%s4393_s0 + $0xa8] sm:$0xff]  ;;  %v2809_v45 = vld [vmem:[%s4393_s0 + $0xb8] sm:$0x3] }
  0x6b   :  { %v1416_v5 = vsel %vm453_vm12, %v1377_v47, 0.0  ;;  %v1383_v16 = vadd.f32 %v1351_v49, %v4535_v17  ;;  %v1384_v48 = vadd.f32 %v1360_v32, %v4536_v42  ;;  %v1418_v29 = vsel %vm453_vm12, %v1378_v50, 0.0  ;;  %v2800_v55 = vld [vmem:[%s4393_s0 + $0xb0] sm:$0xff]  ;;  %v4539_v10 = vld [vmem:[#allocation24_spill] sm:$0xff] }
  0x6c   :  { %v1415_v14 = vadd.f32 %v1414_v36, %v1413_v62  ;;  %v1420_v15 = vsel %vm453_vm12, %v1379_v33, 0.0  ;;  %v1422_v0 = vsel %vm453_vm12, %v1380_v51, 0.0  ;;  %v1424_v25 = vsel %vm453_vm12, %v1381_v40, 0.0  ;;  %v4537_v36 = vld [vmem:[#allocation21_spill] sm:$0xff]  ;;  %v4538_v33 = vld [vmem:[#allocation23_spill] sm:$0xff] }
  0x6d   :  { %v1426_v28 = vsel %vm453_vm12, %v1382_v46, 0.0  ;;  %v1428_v24 = vsel %vm453_vm12, %v1383_v16, 0.0  ;;  %v1430_v61 = vsel %vm499_vm7, %v1384_v48, 0.0  ;;  %v60_v44 = vmax.f32 %v2755_v37, 0.0  ;;  %v4540_v40 = vld [vmem:[#allocation25_spill] sm:$0xff]  ;;  %v4541_v46 = vld [vmem:[#allocation26_spill] sm:$0xff] }
  0x6e   :  { %v1417_v3 = vadd.f32 %v1416_v5, %v1415_v14  ;;  %v61_v47 = vmax.f32 %v2767_v39, 0.0  ;;  %v69_v8 = vmul.f32 0.0, %v4537_v36  ;;  %v70_v62 = vmul.f32 0.0, %v4538_v33 }
  0x6f   :  { %v71_v51 = vmul.f32 0.0, %v4539_v10  ;;  %v72_v18 = vmul.f32 0.0, %v4540_v40  ;;  %v73_v5 = vmul.f32 0.0, %v4541_v46  ;;  %v74_v17 = vmul.f32 0.0, %v2672_v23 }
  0x70   :  { %v1419_v6 = vadd.f32 %v1418_v29, %v1417_v3  ;;  %v75_v16 = vmul.f32 0.0, %v2696_v7  ;;  %v76_v42 = vmul.f32 0.0, %v2701_v12  ;;  %v77_v48 = vmul.f32 0.0, %v2713_v41 }
  0x71   :  { %v78_v14 = vmul.f32 0.0, %v2718_v63  ;;  %v79_v3 = vmul.f32 0.0, %v2725_v26  ;;  %v84_v50 = vmul.f32 0.0, %v2755_v37  ;;  %v85_v43 = vmul.f32 0.0, %v2767_v39 }
  0x72   :  { %v1421_v58 = vadd.f32 %v1420_v15, %v1419_v6  ;;  %v80_v15 = vmul.f32 0.0, %v2730_v4  ;;  %v82_v6 = vmul.f32 0.0, %v2742_v11  ;;  %v86_v49 = vmul.f32 0.0, %v2772_v2 }
  0x73   :  { %v87_v52 = vmul.f32 0.0, %v2779_v53  ;;  %v90_v1 = vmul.f32 0.0, %v2795_v54  ;;  %v91_v9 = vmul.f32 0.0, %v2800_v55  ;;  %v2839_v38 = vmul.f32 0.0, %v2809_v45 }
  0x74   :  { %v1423_v56 = vadd.f32 %v1422_v0, %v1421_v58  ;;  %v81_v0 = vmul.f32 0.0, %v2735_v13  ;;  %v83_v58 = vmul.f32 0.0, %v2747_v22  ;;  %v4542_v59 = vmax.f32 %v4537_v36, 0.0 }
  0x75   :  { %v4544_v20 = vmax.f32 %v4539_v10, 0.0  ;;  %v4545_v34 = vmax.f32 %v4540_v40, 0.0  ;;  %v4546_v21 = vmax.f32 %v4541_v46, 0.0 }
  0x76   :  { %v1425_v29 = vadd.f32 %v1424_v25, %v1423_v56  ;;  %v88_v25 = vmul.f32 0.0, %v2784_v27  ;;  %v89_v56 = vmul.f32 0.0, %v2789_v35  ;;  %v2843_v57 = vsub.f32 %v4542_v59, %v69_v8 }
  0x77   :  { %v2851_v30 = vsub.f32 %v4544_v20, %v71_v51  ;;  %v2855_v19 = vsub.f32 %v4545_v34, %v72_v18  ;;  %v2859_v60 = vsub.f32 %v4546_v21, %v73_v5  ;;  %v4549_v20 = vmax.f32 %v2701_v12, 0.0 }
  0x78   :  { %v1427_v32 = vadd.f32 %v1426_v28, %v1425_v29  ;;  %v4543_v28 = vmax.f32 %v4538_v33, 0.0  ;;  %v118_v34 = vand.u32 2147483647, %v4538_v33  ;;  %v4551_v21 = vmax.f32 %v2713_v41, 0.0 }
  0x79   :  { %v2872_v51 = vsub.f32 %v4549_v20, %v76_v42  ;;  %v4553_v5 = vmax.f32 %v2718_v63, 0.0  ;;  %v4559_v33 = vmax.f32 %v2735_v13, 0.0 }
  0x7a   :  { %v1429_v31 = vadd.f32 %v1428_v24, %v1427_v32  ;;  %v2847_v29 = vsub.f32 %v4543_v28, %v70_v62  ;;  %v4547_v24 = vmax.f32 %v2672_v23, 0.0  ;;  %v117_v32 = vand.u32 2147483647, %v4537_v36 }
  0x7b   :  { %v4548_v62 = vmax.f32 %v2696_v7, 0.0  ;;  %4550 = vst [vmem:[#allocation27_spill] sm:$0xff] %v2872_v51  ;;  %v2877_v18 = vsub.f32 %v4551_v21, %v77_v48  ;;  %v119_v36 = vand.u32 2147483647, %v4539_v10  ;;  %v4561_v48 = vmax.f32 %v2742_v11, 0.0 }
  0x7c   :  { %v2863_v59 = vsub.f32 %v4547_v24, %v74_v17  ;;  %v1431_v8 = vadd.f32 %v1430_v61, %v1429_v31  ;;  %v2881_v17 = vsub.f32 %v4553_v5, %v78_v14  ;;  %v4555_v31 = vmax.f32 %v2725_v26, 0.0 }
  0x7d   :  { %v2868_v28 = vsub.f32 %v4548_v62, %v75_v16  ;;  %4552 = vst [vmem:[#allocation5_spill] sm:$0xff] %v2877_v18  ;;  %v4557_v16 = vmax.f32 %v2730_v4, 0.0  ;;  %v2894_v24 = vsub.f32 %v4559_v33, %v81_v0  ;;  %v2898_v62 = vsub.f32 %v4561_v48, %v82_v6 }
  0x7e   :  { %4554 = vst [vmem:[#allocation6_spill] sm:$0xff] %v2881_v17  ;;  %v2885_v61 = vsub.f32 %v4555_v31, %v79_v3  ;;  %1432 = vadd.xlane.f32.xlu1 %v1431_v8  ;;  %v120_v14 = vand.u32 2147483647, %v4540_v40  ;;  %v4563_v3 = vmax.f32 %v2747_v22, 0.0  ;;  %v2905_v10 = vsub.f32 %v60_v44, %v84_v50 }
  0x7f   :  { %v2890_v42 = vsub.f32 %v4557_v16, %v80_v15  ;;  %4560 = vst [vmem:[#allocation9_spill] sm:$0xff] %v2894_v24  ;;  %4562 = vst [vmem:[#allocation10_spill] sm:$0xff] %v2898_v62  ;;  %v121_v8 = vand.u32 2147483647, %v4541_v46  ;;  %v141_v15 = vsub.f32 0.0, %v117_v32  ;;  %v2908_v21 = vsub.f32 %v61_v47, %v85_v43 }
  0x80   :  { %4556 = vst [vmem:[#allocation7_spill] sm:$0xff] %v2885_v61  ;;  %v2903_v20 = vsub.f32 %v4563_v3, %v83_v58  ;;  %4565 = vst [vmem:[#allocation12_spill] sm:$0xff] %v2905_v10  ;;  %v122_v0 = vand.u32 2147483647, %v2672_v23  ;;  %v123_v5 = vand.u32 2147483647, %v2696_v7 }
  0x81   :  { %4558 = vst [vmem:[#allocation8_spill] sm:$0xff] %v2890_v42  ;;  %4566 = vst [vmem:[#allocation13_spill] sm:$0xff] %v2908_v21  ;;  %v142_v31 = vsub.f32 0.0, %v118_v34  ;;  %v4567_v6 = vmax.f32 %v2772_v2, 0.0  ;;  %v124_v40 = vand.u32 2147483647, %v2701_v12 }
  0x82   :  { %4564 = vst [vmem:[#allocation11_spill] sm:$0xff] %v2903_v20  ;;  %v125_v58 = vand.u32 2147483647, %v2713_v41  ;;  %v143_v44 = vsub.f32 0.0, %v119_v36  ;;  %v4569_v50 = vmax.f32 %v2779_v53, 0.0  ;;  %v144_v43 = vsub.f32 0.0, %v120_v14 }
  0x83   :  { %v2914_v16 = vsub.f32 %v4567_v6, %v86_v49  ;;  %v126_v47 = vand.u32 2147483647, %v2718_v63  ;;  %v127_v23 = vand.u32 2147483647, %v2725_v26  ;;  %v4571_v7 = vmax.f32 %v2784_v27, 0.0 }
  0x84   :  { %v2920_v46 = vsub.f32 %v4569_v50, %v87_v52  ;;  %v128_v49 = vand.u32 2147483647, %v2730_v4  ;;  %v145_v34 = vsub.f32 0.0, %v121_v8  ;;  %v165_v12 = vmul.f32 1.442695, %v141_v15 }
  0x85   :  { %4568 = vst [vmem:[#allocation14_spill] sm:$0xff] %v2914_v16  ;;  %v2926_v32 = vsub.f32 %v4571_v7, %v88_v25  ;;  %v4573_v41 = vmax.f32 %v2789_v35, 0.0  ;;  %v129_v52 = vand.u32 2147483647, %v2735_v13  ;;  %v146_v33 = vsub.f32 0.0, %v122_v0  ;;  %v4651_v18 = vld [vmem:[#allocation6_spill] sm:$0xff] }
  0x86   :  { %4570 = vst [vmem:[#allocation15_spill] sm:$0xff] %v2920_v46  ;;  %v167_v48 = vmul.f32 1.442695, %v142_v31  ;;  %v4575_v63 = vmax.f32 %v2795_v54, 0.0  ;;  %v130_v14 = vand.u32 2147483647, %v2742_v11  ;;  %1724 = vpow2.f32 %v165_v12 }
  0x87   :  { %4572 = vst [vmem:[#allocation16_spill] sm:$0xff] %v2926_v32  ;;  %v2931_v36 = vsub.f32 %v4573_v41, %v89_v56  ;;  %v147_v25 = vsub.f32 0.0, %v123_v5  ;;  %v169_v3 = vmul.f32 1.442695, %v143_v44  ;;  %v4577_v4 = vmax.f32 %v2800_v55, 0.0 }
  0x88   :  { %v2936_v26 = vsub.f32 %v4575_v63, %v90_v1  ;;  %v131_v15 = vand.u32 2147483647, %v2747_v22  ;;  %v148_v56 = vsub.f32 0.0, %v124_v40  ;;  %v171_v6 = vmul.f32 1.442695, %v144_v43 }
  0x89   :  { %4574 = vst [vmem:[#allocation17_spill] sm:$0xff] %v2931_v36  ;;  %v2941_v8 = vsub.f32 %v4577_v4, %v91_v9  ;;  %v132_v13 = vand.u32 2147483647, %v2755_v37  ;;  %v149_v0 = vsub.f32 0.0, %v125_v58  ;;  %v173_v31 = vmul.f32 1.442695, %v145_v34 }
  0x8a   :  { %4576 = vst [vmem:[#allocation18_spill] sm:$0xff] %v2936_v26  ;;  %v133_v1 = vand.u32 2147483647, %v2767_v39  ;;  %v150_v50 = vsub.f32 0.0, %v126_v47  ;;  %1726 = vpow2.f32 %v167_v48  ;;  %v175_v11 = vmul.f32 1.442695, %v146_v33 }
  0x8b   :  { %4578 = vst [vmem:[#allocation19_spill] sm:$0xff] %v2941_v8  ;;  %v134_v5 = vand.u32 2147483647, %v2772_v2  ;;  %v151_v44 = vsub.f32 0.0, %v127_v23  ;;  %1728 = vpow2.f32 %v169_v3  ;;  %v177_v9 = vmul.f32 1.442695, %v147_v25 }
  0x8c   :  { %v135_v7 = vand.u32 2147483647, %v2779_v53  ;;  %v152_v22 = vsub.f32 0.0, %v128_v49  ;;  %1730 = vpow2.f32 %v171_v6  ;;  %v179_v40 = vmul.f32 1.442695, %v148_v56  ;;  %v2971_v25 = vld [vmem:[%s4397_s4] sm:$0xff] }
  0x8d   :  { %v136_v37 = vand.u32 2147483647, %v2784_v27  ;;  %v153_v58 = vsub.f32 0.0, %v129_v52  ;;  %1732 = vpow2.f32 %v173_v31  ;;  %v181_v43 = vmul.f32 1.442695, %v149_v0  ;;  %4583 = vst [vmem:[#allocation23_spill] sm:$0xff] %v2971_v25 }
  0x8e   :  { %v137_v39 = vand.u32 2147483647, %v2789_v35  ;;  %v154_v47 = vsub.f32 0.0, %v130_v14  ;;  %1734 = vpow2.f32 %v175_v11  ;;  %v183_v34 = vmul.f32 1.442695, %v150_v50  ;;  %v2956_v35 = vld [vmem:[%s4396_s3] sm:$0xff] }
  0x8f   :  { %v138_v2 = vand.u32 2147483647, %v2795_v54  ;;  %v155_v23 = vsub.f32 0.0, %v131_v15  ;;  %1736 = vpow2.f32 %v177_v9  ;;  %v185_v12 = vmul.f32 1.442695, %v151_v44  ;;  %4579 = vst [vmem:[#allocation20_spill] sm:$0xff] %v2956_v35 }
  0x90   :  { %v139_v53 = vand.u32 2147483647, %v2800_v55  ;;  %v156_v49 = vsub.f32 0.0, %v132_v13  ;;  %1738 = vpow2.f32 %v179_v40  ;;  %v187_v41 = vmul.f32 1.442695, %v152_v22  ;;  %v2966_v14 = vld [vmem:[%s4396_s3 + $0x8] sm:$0xff] }
  0x91   :  { %v140_v27 = vand.u32 2147483647, %v2809_v45  ;;  %v157_v52 = vsub.f32 0.0, %v133_v1  ;;  %1740 = vpow2.f32 %v181_v43  ;;  %v189_v33 = vmul.f32 1.442695, %v153_v58  ;;  %4582 = vst [vmem:[#allocation21_spill] sm:$0xff] %v2966_v14 }
  0x92   :  { %v4580_v54 = vmax.f32 %v2809_v45, 0.0  ;;  %v158_v63 = vsub.f32 0.0, %v134_v5  ;;  %1742 = vpow2.f32 %v183_v34  ;;  %v191_v55 = vmul.f32 1.442695, %v154_v47  ;;  %v2976_v3 = vld [vmem:[%s4397_s4 + $0x8] sm:$0xff]  ;;  %v2983_v56 = vld [vmem:[%s4396_s3 + $0x10] sm:$0xff] }
  0x93   :  { %4584 = vst [vmem:[#allocation24_spill] sm:$0xff] %v2976_v3  ;;  %v159_v45 = vsub.f32 0.0, %v135_v7  ;;  %v160_v4 = vsub.f32 0.0, %v136_v37  ;;  %1744 = vpow2.f32 %v185_v12  ;;  %v193_v15 = vmul.f32 1.442695, %v155_v23  ;;  %4585 = vst [vmem:[#allocation25_spill] sm:$0xff] %v2983_v56 }
  0x94   :  { %v2961_v48 = vsub.f32 %v4580_v54, %v2839_v38  ;;  %v2978_v38 = vpop.eup %1724  ;;  %v2988_v6 = vld [vmem:[%s4397_s4 + $0x10] sm:$0xff]  ;;  %v161_v0 = vsub.f32 0.0, %v137_v39  ;;  %v162_v31 = vsub.f32 0.0, %v138_v2  ;;  %1746 = vpow2.f32 %v187_v41  ;;  %v2995_v50 = vld [vmem:[%s4396_s3 + $0x18] sm:$0xff]  ;;  %v3007_v22 = vld [vmem:[%s4396_s3 + $0x20] sm:$0xff] }
  0x95   :  { %4586 = vst [vmem:[#allocation26_spill] sm:$0xff] %v2988_v6  ;;  %v2990_v13 = vpop.eup %1726  ;;  %v195_v1 = vmul.f32 1.442695, %v156_v49  ;;  %4587 = vst [vmem:[#allocation28_spill] sm:$0xff] %v2995_v50  ;;  %v3000_v11 = vld [vmem:[%s4397_s4 + $0x18] sm:$0xff]  ;;  %v163_v44 = vsub.f32 0.0, %v139_v53  ;;  %1748 = vpow2.f32 %v189_v33 }
  0x96   :  { %4581 = vst [vmem:[#allocation22_spill] sm:$0xff] %v2961_v48  ;;  %4588 = vst [vmem:[#allocation29_spill] sm:$0xff] %v3000_v11  ;;  %v3002_v5 = vpop.eup %1728  ;;  %v164_v9 = vsub.f32 0.0, %v140_v27  ;;  %v197_v7 = vmul.f32 1.442695, %v157_v52  ;;  %v3012_v40 = vld [vmem:[%s4396_s3 + $0x28] sm:$0xff]  ;;  %1750 = vpow2.f32 %v191_v55 }
  0x97   :  { %4589 = vst [vmem:[#allocation30_spill] sm:$0xff] %v3007_v22  ;;  %4590 = vst [vmem:[#allocation31_spill] sm:$0xff] %v3012_v40  ;;  %v3017_v37 = vld [vmem:[%s4396_s3 + $0x30] sm:$0xff]  ;;  %v3022_v58 = vld [vmem:[%s4397_s4 + $0x20] sm:$0xff]  ;;  %v3034_v47 = vpop.eup %1730  ;;  %v199_v34 = vmul.f32 1.442695, %v158_v63  ;;  %1752 = vpow2.f32 %v193_v15 }
  0x98   :  { %4591 = vst [vmem:[#allocation32_spill] sm:$0xff] %v3017_v37  ;;  %4592 = vst [vmem:[#allocation33_spill] sm:$0xff] %v3022_v58  ;;  %v3027_v43 = vld [vmem:[%s4397_s4 + $0x28] sm:$0xff]  ;;  %v3032_v39 = vld [vmem:[%s4397_s4 + $0x30] sm:$0xff]  ;;  %v3060_v27 = vpop.eup %1732  ;;  %v201_v52 = vmul.f32 1.442695, %v159_v45  ;;  %1754 = vpow2.f32 %v195_v1 }
  0x99   :  { %4593 = vst [vmem:[#allocation34_spill] sm:$0xff] %v3027_v43  ;;  %4594 = vst [vmem:[#allocation35_spill] sm:$0xff] %v3032_v39  ;;  %v3039_v2 = vld [vmem:[%s4396_s3 + $0x38] sm:$0xff]  ;;  %v3044_v23 = vld [vmem:[%s4396_s3 + $0x40] sm:$0xff]  ;;  %v3091_v49 = vpop.eup %1734  ;;  %v203_v48 = vmul.f32 1.442695, %v160_v4  ;;  %1756 = vpow2.f32 %v197_v7 }
  0x9a   :  { %4595 = vst [vmem:[#allocation36_spill] sm:$0xff] %v3039_v2  ;;  %4596 = vst [vmem:[#allocation37_spill] sm:$0xff] %v3044_v23  ;;  %v3049_v12 = vld [vmem:[%s4397_s4 + $0x38] sm:$0xff]  ;;  %v3054_v53 = vld [vmem:[%s4397_s4 + $0x40] sm:$0xff]  ;;  %v205_v8 = vmul.f32 1.442695, %v161_v0  ;;  %v3093_v36 = vpop.eup %1736  ;;  %1758 = vpow2.f32 %v199_v34 }
  0x9b   :  { %4597 = vst [vmem:[#allocation38_spill] sm:$0xff] %v3049_v12  ;;  %4598 = vst [vmem:[#allocation39_spill] sm:$0xff] %v3054_v53  ;;  %v3065_v33 = vld [vmem:[%s4396_s3 + $0x48] sm:$0xff]  ;;  %v3070_v54 = vld [vmem:[%s4396_s3 + $0x50] sm:$0xff]  ;;  %v207_v26 = vmul.f32 1.442695, %v162_v31  ;;  %v3101_v21 = vpop.eup %1738  ;;  %1760 = vpow2.f32 %v201_v52 }
  0x9c   :  { %4599 = vst [vmem:[#allocation40_spill] sm:$0xff] %v3065_v33  ;;  %4600 = vst [vmem:[#allocation41_spill] sm:$0xff] %v3070_v54  ;;  %v3075_v63 = vld [vmem:[%s4396_s3 + $0x58] sm:$0xff]  ;;  %v3080_v55 = vld [vmem:[%s4397_s4 + $0x48] sm:$0xff]  ;;  %v209_v32 = vmul.f32 1.442695, %v163_v44  ;;  %1762 = vpow2.f32 %v203_v48 }
  0x9d   :  { %4601 = vst [vmem:[#allocation42_spill] sm:$0xff] %v3075_v63  ;;  %4602 = vst [vmem:[#allocation43_spill] sm:$0xff] %v3080_v55  ;;  %v3085_v45 = vld [vmem:[%s4397_s4 + $0x50] sm:$0xff]  ;;  %v211_v46 = vmul.f32 1.442695, %v164_v9  ;;  %v216_v16 = vmul.f32 -0.5, %v2978_v38  ;;  %v3119_v9 = vpop.eup %1740  ;;  %1764 = vpow2.f32 %v205_v8 }
  0x9e   :  { %4603 = vst [vmem:[#allocation44_spill] sm:$0xff] %v3085_v45  ;;  %v3099_v15 = vld [vmem:[%s4397_s4 + $0x58] sm:$0xff]  ;;  %v3106_v4 = vld [vmem:[%s4396_s3 + $0x60] sm:$0xff]  ;;  %v225_v7 = vmul.f32 -0.5, %v2990_v13  ;;  %v3126_v10 = vpop.eup %1742  ;;  %v3131_v1 = vld [vmem:[%s4396_s3 + $0x68] sm:$0xff]  ;;  %v213_v31 = vadd.f32 1.0, %v2978_v38  ;;  %1766 = vpow2.f32 %v207_v26 }
  0x9f   :  { %4604 = vst [vmem:[#allocation45_spill] sm:$0xff] %v3099_v15  ;;  %4605 = vst [vmem:[#allocation46_spill] sm:$0xff] %v3106_v4  ;;  %v3111_v0 = vld [vmem:[%s4397_s4 + $0x60] sm:$0xff]  ;;  %v3136_v52 = vld [vmem:[%s4397_s4 + $0x68] sm:$0xff]  ;;  %v3144_v48 = vpop.eup %1744  ;;  %v217_v53 = vadd.f32 1.0, %v216_v16  ;;  %v222_v44 = vadd.f32 1.0, %v2990_v13  ;;  %1768 = vpow2.f32 %v209_v32 }
  0xa0   :  { %4606 = vst [vmem:[#allocation47_spill] sm:$0xff] %v3111_v0  ;;  %4607 = vst [vmem:[#allocation48_spill] sm:$0xff] %v3131_v1  ;;  %v3149_v12 = vpop.eup %1746  ;;  %v234_v55 = vmul.f32 -0.5, %v3002_v5  ;;  %v243_v34 = vmul.f32 -0.5, %v3034_v47  ;;  %v226_v41 = vadd.f32 1.0, %v225_v7  ;;  %v231_v8 = vadd.f32 1.0, %v3002_v5 }
  0xa1   :  { %4608 = vst [vmem:[#allocation49_spill] sm:$0xff] %v3136_v52  ;;  %v3154_v45 = vpop.eup %1748  ;;  %1770 = vpow2.f32 %v211_v46  ;;  %v219_v26 = vand.u32 2147483647, %v2978_v38  ;;  %v228_v23 = vand.u32 2147483647, %v2990_v13  ;;  %v240_v0 = vadd.f32 1.0, %v3034_v47 }
  0xa2   :  { %v3159_v15 = vpop.eup %1750  ;;  %1772 = vlog2.f32 %v213_v31  ;;  %v3167_v32 = vmul.f32 %v2978_v38, %v217_v53  ;;  %v249_v7 = vadd.f32 1.0, %v3060_v27  ;;  %v252_v63 = vmul.f32 -0.5, %v3060_v27 }
  0xa3   :  { %v3164_v4 = vpop.eup %1752  ;;  %1774 = vlog2.f32 %v222_v44  ;;  %v235_v46 = vadd.f32 1.0, %v234_v55  ;;  %v244_v52 = vadd.f32 1.0, %v243_v34  ;;  %v258_v1 = vadd.f32 1.0, %v3091_v49 }
  0xa4   :  { %v3171_v16 = vpop.eup %1754  ;;  %v3177_v33 = vmul.f32 %v2990_v13, %v226_v41  ;;  %1776 = vlog2.f32 %v231_v8  ;;  %v237_v38 = vand.u32 2147483647, %v3002_v5  ;;  %v267_v53 = vadd.f32 1.0, %v3093_v36 }
  0xa5   :  { %v3174_v54 = vpop.eup %1756  ;;  %1778 = vlog2.f32 %v240_v0  ;;  %v246_v2 = vand.u32 2147483647, %v3034_v47  ;;  %v261_v55 = vmul.f32 -0.5, %v3091_v49  ;;  %v276_v44 = vadd.f32 1.0, %v3101_v21 }
  0xa6   :  { %v3181_v31 = vpop.eup %1758  ;;  %1780 = vlog2.f32 %v249_v7  ;;  %v253_v39 = vadd.f32 1.0, %v252_v63  ;;  %v270_v13 = vmul.f32 -0.5, %v3093_v36  ;;  %v285_v41 = vadd.f32 1.0, %v3119_v9 }
  0xa7   :  { %v3186_v34 = vpop.eup %1760  ;;  %v3193_v37 = vmul.f32 %v3002_v5, %v235_v46  ;;  %v3196_v0 = vmul.f32 %v3034_v47, %v244_v52  ;;  %v255_v43 = vand.u32 2147483647, %v3060_v27  ;;  %1782 = vlog2.f32 %v258_v1 }
  0xa8   :  { %v3190_v8 = vpop.eup %1762  ;;  %v264_v7 = vand.u32 2147483647, %v3091_v49  ;;  %1784 = vlog2.f32 %v267_v53  ;;  %v279_v63 = vmul.f32 -0.5, %v3101_v21  ;;  %v294_v20 = vadd.f32 1.0, %v3126_v10 }
  0xa9   :  { %v3199_v40 = vpop.eup %1764  ;;  %v262_v22 = vadd.f32 1.0, %v261_v55  ;;  %1786 = vlog2.f32 %v276_v44  ;;  %v288_v5 = vmul.f32 -0.5, %v3119_v9  ;;  %v303_v47 = vadd.f32 1.0, %v3144_v48 }
  0xaa   :  { %v3204_v58 = vpop.eup %1766  ;;  %vm3210_vm10 = vcmp.lt.f32.partialorder %v219_v26, 0.0004427343  ;;  %vm3214_vm11 = vcmp.lt.f32.partialorder %v228_v23, 0.0004427343  ;;  %v3219_v53 = vmul.f32 %v3060_v27, %v253_v39  ;;  %v271_v62 = vadd.f32 1.0, %v270_v13 }
  0xab   :  { %v3208_v52 = vpop.eup %1768  ;;  %1788 = vlog2.f32 %v285_v41  ;;  %v312_v55 = vadd.f32 1.0, %v3149_v12  ;;  %v273_v11 = vand.u32 2147483647, %v3093_v36  ;;  %v282_v26 = vand.u32 2147483647, %v3101_v21 }
  0xac   :  { %4609 = vst [vmem:[#allocation50_spill] sm:$0xff] %v3208_v52  ;;  %v3222_v44 = vpop.eup %1770  ;;  %v297_v50 = vmul.f32 -0.5, %v3126_v10  ;;  %v306_v23 = vmul.f32 -0.5, %v3144_v48  ;;  %v280_v6 = vadd.f32 1.0, %v279_v63  ;;  %1790 = vlog2.f32 %v294_v20 }
  0xad   :  { %4614 = vst [vmem:[#allocation51_spill] sm:$0xff] %v3222_v44  ;;  %v1773_v24 = vpop.eup %1772  ;;  %v315_v39 = vmul.f32 -0.5, %v3149_v12  ;;  %v321_v27 = vadd.f32 1.0, %v3154_v45  ;;  %vm3230_vm13 = vcmp.lt.f32.partialorder %v237_v38, 0.0004427343  ;;  %v3235_v56 = vmul.f32 %v3091_v49, %v262_v22 }
  0xae   :  { %v1775_v13 = vpop.eup %1774  ;;  %v289_v3 = vadd.f32 1.0, %v288_v5  ;;  %v291_v14 = vand.u32 2147483647, %v3119_v9  ;;  %1792 = vlog2.f32 %v303_v47  ;;  %vm3238_vm14 = vcmp.lt.f32.partialorder %v246_v2, 0.0004427343 }
  0xaf   :  { %v1777_v25 = vpop.eup %1776  ;;  %vm3242_vm15 = vcmp.lt.f32.partialorder %v255_v43, 0.0004427343  ;;  %v3247_v38 = vmul.f32 %v3093_v36, %v271_v62  ;;  %v300_v35 = vand.u32 2147483647, %v3126_v10  ;;  %1794 = vlog2.f32 %v312_v55 }
  0xb0   :  { %v330_v22 = vadd.f32 1.0, %v3159_v15  ;;  %v1779_v49 = vpop.eup %1778  ;;  %vm3251_vm0 = vcmp.lt.f32.partialorder %v264_v7, 0.0004427343  ;;  %v298_v2 = vadd.f32 1.0, %v297_v50  ;;  %v307_v47 = vadd.f32 1.0, %v306_v23 }
  0xb1   :  { %v309_v43 = vand.u32 2147483647, %v3144_v48  ;;  %v324_v42 = vmul.f32 -0.5, %v3154_v45  ;;  %v1781_v61 = vpop.eup %1780  ;;  %vm3257_vm1 = vcmp.lt.f32.partialorder %v273_v11, 0.0004427343  ;;  %v3262_v36 = vmul.f32 %v3101_v21, %v280_v6 }
  0xb2   :  { %vm3264_vm2 = vcmp.lt.f32.partialorder %v282_v26, 0.0004427343  ;;  %v316_v7 = vadd.f32 1.0, %v315_v39  ;;  %v318_v50 = vand.u32 2147483647, %v3149_v12  ;;  %1796 = vlog2.f32 %v321_v27  ;;  %v1783_v23 = vpop.eup %1782 }
  0xb3   :  { %v3269_v17 = vmul.f32 0.6931472, %v1773_v24  ;;  %v3271_v44 = vmul.f32 0.6931472, %v1775_v13  ;;  %v3274_v11 = vmul.f32 %v3119_v9, %v289_v3  ;;  %vm3276_vm3 = vcmp.lt.f32.partialorder %v291_v14, 0.0004427343  ;;  %v1785_v21 = vpop.eup %1784 }
  0xb4   :  { %vm3280_vm4 = vcmp.lt.f32.partialorder %v300_v35, 0.0004427343  ;;  %v327_v26 = vand.u32 2147483647, %v3154_v45  ;;  %1798 = vlog2.f32 %v330_v22  ;;  %v333_v24 = vmul.f32 -0.5, %v3159_v15  ;;  %v1787_v27 = vpop.eup %1786 }
  0xb5   :  { %v339_v39 = vadd.f32 1.0, %v3164_v4  ;;  %v3288_v3 = vmul.f32 %v3126_v10, %v298_v2  ;;  %v3291_v14 = vmul.f32 %v3144_v48, %v307_v47  ;;  %vm3293_vm5 = vcmp.lt.f32.partialorder %v309_v43, 0.0004427343  ;;  %v1789_v13 = vpop.eup %1788 }
  0xb6   :  { %v325_v35 = vadd.f32 1.0, %v324_v42  ;;  %v233_v52 = vmul.f32 0.6931472, %v1777_v25  ;;  %v3298_v22 = vmul.f32 %v3149_v12, %v316_v7  ;;  %vm3300_vm6 = vcmp.lt.f32.partialorder %v318_v50, 0.0004427343  ;;  %v1791_v12 = vpop.eup %1790 }
  0xb7   :  { %v342_v10 = vmul.f32 -0.5, %v3164_v4  ;;  %v221_v48 = vsel %vm3210_vm10, %v3167_v32, %v3269_v17  ;;  %v230_v42 = vsel %vm3214_vm11, %v3177_v33, %v3271_v44  ;;  %v242_v25 = vmul.f32 0.6931472, %v1779_v49 }
  0xb8   :  { %v3313_v2 = vmul.f32 0.6931472, %v1781_v61  ;;  %v3315_v47 = vmul.f32 0.6931472, %v1783_v23  ;;  %vm3317_vm8 = vcmp.lt.f32.partialorder %v327_v26, 0.0004427343  ;;  %1800 = vlog2.f32 %v339_v39  ;;  %v1793_v17 = vpop.eup %1792 }
  0xb9   :  { %v334_v7 = vadd.f32 1.0, %v333_v24  ;;  %v336_v50 = vand.u32 2147483647, %v3159_v15  ;;  %v3322_v32 = vmul.f32 0.6931472, %v1785_v21  ;;  %v3329_v61 = vmul.f32 %v3154_v45, %v325_v35  ;;  %v1795_v46 = vpop.eup %1794 }
  0xba   :  { %v3324_v1 = vmul.f32 0.6931472, %v1787_v27  ;;  %v3326_v33 = vmul.f32 0.6931472, %v1789_v13  ;;  %v239_v44 = vsel %vm3230_vm13, %v3193_v37, %v233_v52  ;;  %v343_v49 = vadd.f32 1.0, %v342_v10 }
  0xbb   :  { %v348_v23 = vadd.f32 1.0, %v3171_v16  ;;  %v351_v26 = vmul.f32 -0.5, %v3171_v16  ;;  %v248_v21 = vsel %vm3238_vm14, %v3196_v0, %v242_v25  ;;  %v257_v45 = vsel %vm3242_vm15, %v3219_v53, %v3313_v2 }
  0xbc   :  { %v3343_v24 = vmul.f32 0.6931472, %v1791_v12  ;;  %v345_v39 = vand.u32 2147483647, %v3164_v4  ;;  %v1797_v41 = vpop.eup %1796  ;;  %v266_v37 = vsel %vm3251_vm0, %v3235_v56, %v3315_v47  ;;  %v3350_v52 = vmul.f32 0.6931472, %v1793_v17 }
  0xbd   :  { %v3353_v63 = vmul.f32 %v3159_v15, %v334_v7  ;;  %vm3355_vm9 = vcmp.lt.f32.partialorder %v336_v50, 0.0004427343  ;;  %v275_v53 = vsel %vm3257_vm1, %v3247_v38, %v3322_v32  ;;  %v284_v20 = vsel %vm3264_vm2, %v3262_v36, %v3324_v1 }
  0xbe   :  { %v293_v56 = vsel %vm3276_vm3, %v3274_v11, %v3326_v33  ;;  %v3371_v15 = vmul.f32 0.6931472, %v1795_v46  ;;  %v1799_v5 = vpop.eup %1798  ;;  %v3374_v27 = vmul.f32 %v3164_v4, %v343_v49  ;;  %1802 = vlog2.f32 %v348_v23 }
  0xbf   :  { %v352_v35 = vadd.f32 1.0, %v351_v26  ;;  %v357_v38 = vadd.f32 1.0, %v3174_v54  ;;  %v302_v62 = vsel %vm3280_vm4, %v3288_v3, %v3343_v24  ;;  %v3381_v13 = vmul.f32 0.6931472, %v1797_v41 }
  0xc0   :  { %vm3383_vm10 = vcmp.lt.f32.partialorder %v345_v39, 0.0004427343  ;;  %v360_v25 = vmul.f32 -0.5, %v3174_v54  ;;  %v311_v4 = vsel %vm3293_vm5, %v3291_v14, %v3350_v52  ;;  %v354_v2 = vand.u32 2147483647, %v3171_v16 }
  0xc1   :  { %v366_v12 = vadd.f32 1.0, %v3181_v31  ;;  %v369_v47 = vmul.f32 -0.5, %v3181_v31  ;;  %v3399_v50 = vmul.f32 0.6931472, %v1799_v5  ;;  %v378_v17 = vmul.f32 -0.5, %v3186_v34 }
  0xc2   :  { %v429_v32 = vadd.f32 %v221_v48, %v2843_v57  ;;  %v1801_v46 = vpop.eup %1800  ;;  %v3404_v49 = vmul.f32 %v3171_v16, %v352_v35  ;;  %1804 = vlog2.f32 %v357_v38  ;;  %v430_v23 = vadd.f32 %v230_v42, %v2847_v29  ;;  %v4676_v48 = vld [vmem:[#allocation30_spill] sm:$0xff] }
  0xc3   :  { %v431_v26 = vadd.f32 %v239_v44, %v2851_v30  ;;  %v329_v39 = vsel %vm3317_vm8, %v3329_v61, %v3381_v13  ;;  %v361_v41 = vadd.f32 1.0, %v360_v25  ;;  %v363_v5 = vand.u32 2147483647, %v3174_v54 }
  0xc4   :  { %v375_v7 = vadd.f32 1.0, %v3186_v34  ;;  %vm3414_vm11 = vcmp.lt.f32.partialorder %v354_v2, 0.0004427343  ;;  %1806 = vlog2.f32 %v366_v12  ;;  %v370_v16 = vadd.f32 1.0, %v369_v47 }
  0xc5   :  { %v372_v29 = vand.u32 2147483647, %v3181_v31  ;;  %v432_v30 = vadd.f32 %v248_v21, %v2855_v19  ;;  %v3424_v42 = vmul.f32 0.6931472, %v1801_v46  ;;  %v379_v44 = vadd.f32 1.0, %v378_v17  ;;  %v4658_v17 = vld [vmem:[#allocation23_spill] sm:$0xff] }
  0xc6   :  { %v454_v35 = vsel %vm453_vm12, %v429_v32, 0.0  ;;  %v387_v38 = vmul.f32 -0.5, %v3190_v8  ;;  %v433_v25 = vadd.f32 %v257_v45, %v2859_v60  ;;  %v455_v2 = vsel %vm453_vm12, %v430_v23, 0.0 }
  0xc7   :  { %v457_v12 = vsel %vm453_vm12, %v431_v26, 0.0  ;;  %v3432_v19 = vmul.f32 %v3174_v54, %v361_v41  ;;  %1808 = vlog2.f32 %v375_v7  ;;  %v381_v21 = vand.u32 2147483647, %v3186_v34 }
  0xc8   :  { %v456_v47 = vadd.f32 %v455_v2, %v454_v35  ;;  %v1803_v46 = vpop.eup %1802  ;;  %vm3435_vm13 = vcmp.lt.f32.partialorder %v363_v5, 0.0004427343  ;;  %v3440_v32 = vmul.f32 %v3181_v31, %v370_v16  ;;  %v384_v60 = vadd.f32 1.0, %v3190_v8 }
  0xc9   :  { %v434_v45 = vadd.f32 %v266_v37, %v2863_v59  ;;  %v459_v23 = vsel %vm453_vm12, %v432_v30, 0.0  ;;  %v393_v7 = vadd.f32 1.0, %v3199_v40  ;;  %v396_v26 = vmul.f32 -0.5, %v3199_v40 }
  0xca   :  { %v458_v41 = vadd.f32 %v457_v12, %v456_v47  ;;  %v3452_v5 = vmul.f32 %v3186_v34, %v379_v44  ;;  %v388_v31 = vadd.f32 1.0, %v387_v38  ;;  %v435_v16 = vadd.f32 %v275_v53, %v2868_v28  ;;  %v4647_v44 = vld [vmem:[#allocation27_spill] sm:$0xff] }
  0xcb   :  { %v461_v59 = vsel %vm453_vm12, %v433_v25, 0.0  ;;  %v3456_v37 = vmul.f32 0.6931472, %v1803_v46  ;;  %v390_v30 = vand.u32 2147483647, %v3190_v8  ;;  %v405_v35 = vmul.f32 -0.5, %v3204_v58 }
  0xcc   :  { %v460_v2 = vadd.f32 %v459_v23, %v458_v41  ;;  %v1805_v54 = vpop.eup %1804  ;;  %vm3460_vm14 = vcmp.lt.f32.partialorder %v372_v29, 0.0004427343  ;;  %1810 = vlog2.f32 %v384_v60  ;;  %v399_v34 = vand.u32 2147483647, %v3199_v40  ;;  %v4648_v46 = vld [vmem:[#allocation50_spill] sm:$0xff]  ;;  %v4649_v23 = vld [vmem:[#allocation5_spill] sm:$0xff] }
  0xcd   :  { %v436_v28 = vadd.f32 %v284_v20, %v4647_v44  ;;  %v463_v53 = vsel %vm453_vm12, %v434_v45, 0.0  ;;  %1812 = vlog2.f32 %v393_v7  ;;  %v397_v38 = vadd.f32 1.0, %v396_v26  ;;  %v4650_v26 = vld [vmem:[#allocation51_spill] sm:$0xff] }
  0xce   :  { %v402_v25 = vadd.f32 1.0, %v3204_v58  ;;  %v462_v29 = vadd.f32 %v461_v59, %v460_v2  ;;  %v1807_v12 = vpop.eup %1806  ;;  %v3474_v47 = vmul.f32 %v3190_v8, %v388_v31  ;;  %v411_v60 = vadd.f32 1.0, %v4648_v46 }
  0xcf   :  { %v437_v36 = vadd.f32 %v293_v56, %v4649_v23  ;;  %v465_v55 = vsel %vm453_vm12, %v435_v16, 0.0  ;;  %v356_v1 = vsel %vm3414_vm11, %v3404_v49, %v3456_v37  ;;  %v3488_v20 = vmul.f32 0.6931472, %v1805_v54  ;;  %v4664_v23 = vld [vmem:[#allocation26_spill] sm:$0xff] }
  0xd0   :  { %v406_v8 = vadd.f32 1.0, %v405_v35  ;;  %v464_v45 = vadd.f32 %v463_v53, %v462_v29  ;;  %v414_v7 = vmul.f32 -0.5, %v4648_v46  ;;  %v420_v41 = vadd.f32 1.0, %v4650_v26  ;;  %v4654_v35 = vld [vmem:[#allocation7_spill] sm:$0xff]  ;;  %v4657_v53 = vld [vmem:[#allocation20_spill] sm:$0xff] }
  0xd1   :  { %v438_v11 = vadd.f32 %v302_v62, %v4651_v18  ;;  %v467_v33 = vsel %vm453_vm12, %v436_v28, 0.0  ;;  %v1809_v56 = vpop.eup %1808  ;;  %vm3499_vm15 = vcmp.lt.f32.partialorder %v381_v21, 0.0004427343  ;;  %v3504_v54 = vmul.f32 %v3199_v40, %v397_v38  ;;  %v4655_v28 = vld [vmem:[#allocation8_spill] sm:$0xff] }
  0xd2   :  { %1814 = vlog2.f32 %v402_v25  ;;  %v408_v16 = vand.u32 2147483647, %v3204_v58  ;;  %v466_v59 = vadd.f32 %v465_v55, %v464_v45  ;;  %v417_v6 = vand.u32 2147483647, %v4648_v46  ;;  %v4660_v25 = vld [vmem:[#allocation21_spill] sm:$0xff] }
  0xd3   :  { %1816 = vlog2.f32 %v411_v60  ;;  %v439_v3 = vadd.f32 %v311_v4, %v4654_v35  ;;  %v469_v24 = vsel %vm453_vm12, %v437_v36, 0.0  ;;  %v365_v40 = vsel %vm3435_vm13, %v3432_v19, %v3488_v20  ;;  %v4663_v60 = vld [vmem:[#allocation25_spill] sm:$0xff]  ;;  %v4701_v20 = vld [vmem:[#allocation40_spill] sm:$0xff] }
  0xd4   :  { %v368_v62 = vmul.f32 0.6931472, %v1807_v12  ;;  %v3520_v21 = vmul.f32 %v3204_v58, %v406_v8  ;;  %v468_v2 = vadd.f32 %v467_v33, %v466_v59  ;;  %v415_v44 = vadd.f32 1.0, %v414_v7  ;;  %v4661_v58 = vld [vmem:[#allocation24_spill] sm:$0xff]  ;;  %v4668_v8 = vld [vmem:[#allocation9_spill] sm:$0xff] }
  0xd5   :  { %1818 = vlog2.f32 %v420_v41  ;;  %v4656_v14 = vsel %vm3300_vm6, %v3298_v22, %v3371_v15  ;;  %v471_v52 = vsel %vm453_vm12, %v438_v11, 0.0  ;;  %v4659_v19 = vsub.f32 %v4657_v53, %v4658_v17  ;;  %v4671_v59 = vld [vmem:[#allocation28_spill] sm:$0xff]  ;;  %v4672_v35 = vld [vmem:[#allocation29_spill] sm:$0xff] }
  0xd6   :  { %v440_v9 = vadd.f32 %v4656_v14, %v4655_v28  ;;  %v470_v4 = vadd.f32 %v469_v24, %v468_v2  ;;  %v4662_v29 = vsub.f32 %v4660_v25, %v4661_v58  ;;  %v4665_v36 = vsub.f32 %v4663_v60, %v4664_v23  ;;  %v1811_v51 = vpop.eup %1810  ;;  %v4674_v2 = vld [vmem:[#allocation10_spill] sm:$0xff] }
  0xd7   :  { %v1514_v38 = vand.u32 2147483647, %v4659_v19  ;;  %vm3538_vm0 = vcmp.lt.f32.partialorder %v390_v30, 0.0004427343  ;;  %v423_v22 = vmul.f32 -0.5, %v4650_v26  ;;  %v441_v45 = vadd.f32 %v329_v39, %v4668_v8  ;;  %v1813_v41 = vpop.eup %1812  ;;  %v4684_v25 = vld [vmem:[#allocation34_spill] sm:$0xff] }
  0xd8   :  { %v1515_v12 = vand.u32 2147483647, %v4662_v29  ;;  %v1516_v55 = vand.u32 2147483647, %v4665_v36  ;;  %v426_v15 = vand.u32 2147483647, %v4650_v26  ;;  %v374_v30 = vsel %vm3460_vm14, %v3440_v32, %v368_v62 }
  0xd9   :  { %v473_v7 = vsel %vm453_vm12, %v439_v3, 0.0  ;;  %v377_v18 = vmul.f32 0.6931472, %v1809_v56  ;;  %vm3554_vm1 = vcmp.lt.f32.partialorder %v399_v34, 0.0004427343  ;;  %v472_v33 = vadd.f32 %v471_v52, %v470_v4  ;;  %v4677_v32 = vld [vmem:[#allocation33_spill] sm:$0xff] }
  0xda   :  { %v4673_v43 = vsub.f32 %v4671_v59, %v4672_v35  ;;  %v4675_v61 = vsel %vm3355_vm9, %v3353_v63, %v3399_v50  ;;  %v475_v39 = vsel %vm453_vm12, %v440_v9, 0.0  ;;  %v4678_v34 = vsub.f32 %v4676_v48, %v4677_v32  ;;  %v4681_v50 = vld [vmem:[#allocation11_spill] sm:$0xff]  ;;  %v4694_v35 = vld [vmem:[#allocation38_spill] sm:$0xff]  ;;  %v4697_v32 = vld [vmem:[#allocation37_spill] sm:$0xff] }
  0xdb   :  { %v442_v13 = vadd.f32 %v4675_v61, %v4674_v2  ;;  %vm1538_vm2 = vcmask 261120   ;;  %vm3571_vm3 = vcmp.lt.f32.partialorder %v408_v16, 0.0004427343  ;;  %v474_v62 = vadd.f32 %v473_v7, %v472_v33  ;;  %v4690_v8 = vld [vmem:[#allocation35_spill] sm:$0xff]  ;;  %v4696_v61 = vld [vmem:[#allocation14_spill] sm:$0xff] }
  0xdc   :  { %v1517_v24 = vand.u32 2147483647, %v4673_v43  ;;  %v1518_v56 = vand.u32 2147483647, %v4678_v34  ;;  %v1539_v28 = vsel %vm1538_vm2, %v1514_v38, 0.0  ;;  %v1540_v0 = vsel %vm1538_vm2, %v1515_v12, 0.0  ;;  %v1815_v53 = vpop.eup %1814 }
  0xdd   :  { %v1542_v14 = vsel %vm1538_vm2, %v1516_v55, 0.0  ;;  %v3579_v63 = vmul.f32 %v4648_v46, %v415_v44  ;;  %v4682_v9 = vsel %vm3383_vm10, %v3374_v27, %v3424_v42  ;;  %v477_v52 = vsel %vm453_vm12, %v441_v45, 0.0  ;;  %v4683_v38 = vld [vmem:[#allocation31_spill] sm:$0xff]  ;;  %v1817_v44 = vpop.eup %1816  ;;  %v4688_v42 = vld [vmem:[#allocation12_spill] sm:$0xff] }
  0xde   :  { %v443_v16 = vadd.f32 %v4682_v9, %v4681_v50  ;;  %v1541_v4 = vadd.f32 %v1540_v0, %v1539_v28  ;;  %v424_v17 = vadd.f32 1.0, %v423_v22  ;;  %v476_v19 = vadd.f32 %v475_v39, %v474_v62  ;;  %v4689_v22 = vld [vmem:[#allocation32_spill] sm:$0xff]  ;;  %v4698_v34 = vld [vmem:[#allocation39_spill] sm:$0xff] }
  0xdf   :  { %v4685_v58 = vsub.f32 %v4683_v38, %v4684_v25  ;;  %v1544_v46 = vsel %vm1538_vm2, %v1517_v24, 0.0  ;;  %v383_v10 = vsel %vm3499_vm15, %v3452_v5, %v377_v18  ;;  %vm3595_vm4 = vcmp.lt.f32.partialorder %v417_v6, 0.0004427343  ;;  %v1819_v45 = vpop.eup %1818  ;;  %v4692_v18 = vld [vmem:[#allocation13_spill] sm:$0xff]  ;;  %v4704_v38 = vld [vmem:[#allocation16_spill] sm:$0xff]  ;;  %v1456_v25 = vld [vmem:[%s4396_s3 + $0x70] sm:$0xff] }
  0xe0   :  { %v444_v12 = vadd.f32 %v356_v1, %v4688_v42  ;;  %v479_v60 = vsel %vm453_vm12, %v442_v13, 0.0  ;;  %v1543_v23 = vadd.f32 %v1542_v14, %v1541_v4  ;;  %v386_v36 = vmul.f32 0.6931472, %v1811_v51  ;;  %v4693_v1 = vld [vmem:[#allocation36_spill] sm:$0xff]  ;;  %v4700_v14 = vld [vmem:[#allocation15_spill] sm:$0xff] }
  0xe1   :  { %v1519_v29 = vand.u32 2147483647, %v4685_v58  ;;  %v478_v55 = vadd.f32 %v477_v52, %v476_v19  ;;  %v4691_v31 = vsub.f32 %v4689_v22, %v4690_v8  ;;  %v1546_v6 = vsel %vm1538_vm2, %v1518_v56, 0.0  ;;  %v4706_v42 = vld [vmem:[#allocation44_spill] sm:$0xff] }
  0xe2   :  { %v395_v7 = vmul.f32 0.6931472, %v1813_v41  ;;  %v445_v33 = vadd.f32 %v365_v40, %v4692_v18  ;;  %v481_v57 = vsel %vm453_vm12, %v443_v16, 0.0  ;;  %v1545_v59 = vadd.f32 %v1544_v46, %v1543_v23  ;;  %v4710_v23 = vld [vmem:[#allocation17_spill] sm:$0xff]  ;;  %v1481_v27 = vld [vmem:[%s4397_s4 + $0x78] sm:$0xff] }
  0xe3   :  { %v1520_v5 = vand.u32 2147483647, %v4691_v31  ;;  %v425_v49 = vmul.f32 %v4650_v26, %v424_v17  ;;  %v480_v37 = vadd.f32 %v479_v60, %v478_v55  ;;  %v4695_v51 = vsub.f32 %v4693_v1, %v4694_v35  ;;  %v4715_v35 = vld [vmem:[#allocation46_spill] sm:$0xff] }
  0xe4   :  { %v1548_v24 = vsel %vm1538_vm2, %v1519_v29, 0.0  ;;  %v404_v2 = vmul.f32 0.6931472, %v1815_v53  ;;  %v446_v13 = vadd.f32 %v374_v30, %v4696_v61  ;;  %v483_v39 = vsel %vm453_vm12, %v444_v12, 0.0  ;;  %v4718_v61 = vld [vmem:[#allocation19_spill] sm:$0xff] }
  0xe5   :  { %v1521_v43 = vand.u32 2147483647, %v4695_v51  ;;  %v1547_v41 = vadd.f32 %v1546_v6, %v1545_v59  ;;  %v392_v40 = vsel %vm3538_vm0, %v3474_v47, %v386_v36  ;;  %v482_v48 = vadd.f32 %v481_v57, %v480_v37  ;;  %v4702_v47 = vld [vmem:[#allocation43_spill] sm:$0xff]  ;;  %v4712_v6 = vld [vmem:[#allocation45_spill] sm:$0xff]  ;;  %v1457_v57 = vld [vmem:[%s4396_s3 + $0x78] sm:$0xff] }
  0xe6   :  { %v4699_v56 = vsub.f32 %v4697_v32, %v4698_v34  ;;  %v1550_v28 = vsel %vm1538_vm2, %v1520_v5, 0.0  ;;  %v401_v0 = vsel %vm3554_vm1, %v3504_v54, %v395_v7  ;;  %v447_v30 = vadd.f32 %v383_v10, %v4700_v14  ;;  %v4705_v10 = vld [vmem:[#allocation41_spill] sm:$0xff]  ;;  %v4711_v5 = vld [vmem:[#allocation42_spill] sm:$0xff]  ;;  %v4716_v51 = vld [vmem:[#allocation47_spill] sm:$0xff] }
  0xe7   :  { %v485_v50 = vsel %vm453_vm12, %v445_v33, 0.0  ;;  %v1549_v9 = vadd.f32 %v1548_v24, %v1547_v41  ;;  %v413_v16 = vmul.f32 0.6931472, %v1817_v44  ;;  %v484_v52 = vadd.f32 %v483_v39, %v482_v48  ;;  %v1480_v44 = vld [vmem:[%s4397_s4 + $0x70] sm:$0xff]  ;;  %v1458_v41 = vld [vmem:[%s4396_s3 + $0x80] sm:$0xff]  ;;  %v4719_v34 = vld [vmem:[#allocation48_spill] sm:$0xff] }
  0xe8   :  { %v1522_v62 = vand.u32 2147483647, %v4699_v56  ;;  %v4703_v4 = vsub.f32 %v4701_v20, %v4702_v47  ;;  %v1552_v17 = vsel %vm1538_vm2, %v1521_v43, 0.0  ;;  %v410_v19 = vsel %vm3571_vm3, %v3520_v21, %v404_v2  ;;  %v4720_v56 = vld [vmem:[#allocation49_spill] sm:$0xff]  ;;  %v4722_v14 = vld [vmem:[#allocation22_spill] sm:$0xff] }
  0xe9   :  { %v448_v11 = vadd.f32 %v392_v40, %v4704_v38  ;;  %v487_v54 = vsel %vm453_vm12, %v446_v13, 0.0  ;;  %v1551_v58 = vadd.f32 %v1550_v28, %v1549_v9  ;;  %v422_v29 = vmul.f32 0.6931472, %v1819_v45  ;;  %v1482_v40 = vld [vmem:[%s4397_s4 + $0x80] sm:$0xff]  ;;  %v1459_v9 = vld [vmem:[%s4396_s3 + $0x88] sm:$0xff]  ;;  %v1484_v38 = vld [vmem:[%s4397_s4 + $0x90] sm:$0xff] }
  0xea   :  { %v1523_v53 = vand.u32 2147483647, %v4703_v4  ;;  %v486_v46 = vadd.f32 %v485_v50, %v484_v52  ;;  %v4707_v12 = vsub.f32 %v4705_v10, %v4706_v42  ;;  %v1554_v21 = vsel %vm1538_vm2, %v1522_v62, 0.0  ;;  %v1485_v10 = vld [vmem:[%s4397_s4 + $0x98] sm:$0xff] }
  0xeb   :  { %vm3652_vm5 = vcmp.lt.f32.partialorder %v426_v15, 0.0004427343  ;;  %v449_v36 = vadd.f32 %v401_v0, %v4710_v23  ;;  %v489_v55 = vsel %vm453_vm12, %v447_v30, 0.0  ;;  %v1553_v22 = vadd.f32 %v1552_v17, %v1551_v58  ;;  %v4714_v15 = vld [vmem:[#allocation18_spill] sm:$0xff]  ;;  %v1462_v23 = vld [vmem:[%s4396_s3 + $0xa0] sm:$0xff] }
  0xec   :  { %v1524_v3 = vand.u32 2147483647, %v4707_v12  ;;  %v419_v8 = vsel %vm3595_vm4, %v3579_v63, %v413_v16  ;;  %v488_v31 = vadd.f32 %v487_v54, %v486_v46  ;;  %v4713_v45 = vsub.f32 %v4711_v5, %v4712_v6  ;;  %v1483_v16 = vld [vmem:[%s4397_s4 + $0x88] sm:$0xff] }
  0xed   :  { %v1556_v26 = vsel %vm1538_vm2, %v1523_v53, 0.0  ;;  %v450_v18 = vadd.f32 %v410_v19, %v4714_v15  ;;  %v491_v33 = vsel %vm453_vm12, %v448_v11, 0.0  ;;  %v1504_v63 = vsub.f32 %v1456_v25, %v1480_v44  ;;  %v1460_v19 = vld [vmem:[%s4396_s3 + $0x90] sm:$0xff]  ;;  %v1461_v44 = vld [vmem:[%s4396_s3 + $0x98] sm:$0xff]  ;;  %v1463_v6 = vld [vmem:[%s4396_s3 + $0xa8] sm:$0xff] }
  0xee   :  { %v1525_v7 = vand.u32 2147483647, %v4713_v45  ;;  %v1555_v59 = vadd.f32 %v1554_v21, %v1553_v22  ;;  %v428_v37 = vsel %vm3652_vm5, %v425_v49, %v422_v29  ;;  %v490_v1 = vadd.f32 %v489_v55, %v488_v31  ;;  %v1487_v45 = vld [vmem:[%s4397_s4 + $0xa8] sm:$0xff] }
  0xef   :  { %v4717_v43 = vsub.f32 %v4715_v35, %v4716_v51  ;;  %v1558_v2 = vsel %vm1538_vm2, %v1524_v3, 0.0  ;;  %v451_v13 = vadd.f32 %v419_v8, %v4718_v61  ;;  %v493_v39 = vsel %vm453_vm12, %v449_v36, 0.0  ;;  %v1486_v36 = vld [vmem:[%s4397_s4 + $0xa0] sm:$0xff]  ;;  %v1489_v35 = vld [vmem:[%s4397_s4 + $0xb8] sm:$0xff] }
  0xf0   :  { %v1557_v49 = vadd.f32 %v1556_v26, %v1555_v59  ;;  %v492_v48 = vadd.f32 %v491_v33, %v490_v1  ;;  %v1505_v32 = vsub.f32 %v1457_v57, %v1481_v27  ;;  %v4721_v62 = vsub.f32 %v4719_v34, %v4720_v56  ;;  %v1464_v33 = vld [vmem:[%s4396_s3 + $0xb0] sm:$0xff]  ;;  %v1465_v1 = vld [vmem:[%s4396_s3 + $0xb8] sm:$0xff] }
  0xf1   :  { %v1526_v24 = vand.u32 2147483647, %v4717_v43  ;;  %v1560_v0 = vsel %vm1538_vm2, %v1525_v7, 0.0  ;;  %v452_v30 = vadd.f32 %v428_v37, %v4722_v14  ;;  %v495_v50 = vsel %vm453_vm12, %v450_v18, 0.0  ;;  %v1488_v57 = vld [vmem:[%s4397_s4 + $0xb0] sm:$0xff] }
  0xf2   :  { %v1527_v28 = vand.u32 2147483647, %v4721_v62  ;;  %v1559_v52 = vadd.f32 %v1558_v2, %v1557_v49  ;;  %v494_v20 = vadd.f32 %v493_v39, %v492_v48  ;;  %v1506_v47 = vsub.f32 %v1458_v41, %v1482_v40 }
  0xf3   :  { %v1528_v4 = vand.u32 2147483647, %v1504_v63  ;;  %v1562_v53 = vsel %vm1538_vm2, %v1526_v24, 0.0  ;;  %v497_v17 = vsel %vm453_vm12, %v451_v13, 0.0  ;;  %v1507_v25 = vsub.f32 %v1459_v9, %v1483_v16  ;;  %v513_v9 = vld [vmem:[%s4394_s1 + $0x8] sm:$0xff]  ;;  %v3758_v16 = vld [vmem:[%s4394_s1 + $0x10] sm:$0xff] }
  0xf4   :  { %v1561_v11 = vadd.f32 %v1560_v0, %v1559_v52  ;;  %v496_v54 = vadd.f32 %v495_v50, %v494_v20  ;;  %v1529_v58 = vand.u32 2147483647, %v1505_v32  ;;  %v1564_v29 = vsel %vm1538_vm2, %v1527_v28, 0.0  ;;  %v512_v50 = vld [vmem:[%s4394_s1] sm:$0xff]  ;;  %v3763_v52 = vld [vmem:[%s4394_s1 + $0x18] sm:$0xff] }
  0xf5   :  { %v500_v46 = vsel %vm499_vm7, %v452_v30, 0.0  ;;  %v1508_v3 = vsub.f32 %v1460_v19, %v1484_v38  ;;  %v1530_v21 = vand.u32 2147483647, %v1506_v47  ;;  %v1566_v60 = vsel %vm1538_vm2, %v1528_v4, 0.0  ;;  %v3768_v47 = vld [vmem:[%s4394_s1 + $0x20] sm:$0xff]  ;;  %v3773_v4 = vld [vmem:[%s4394_s1 + $0x28] sm:$0xff] }
  0xf6   :  { %v1563_v42 = vadd.f32 %v1562_v53, %v1561_v11  ;;  %v498_v12 = vadd.f32 %v497_v17, %v496_v54  ;;  %v1509_v8 = vsub.f32 %v1461_v44, %v1485_v10  ;;  %v1531_v31 = vand.u32 2147483647, %v1507_v25  ;;  %v3778_v53 = vld [vmem:[%s4394_s1 + $0x30] sm:$0xff]  ;;  %v3783_v17 = vld [vmem:[%s4394_s1 + $0x38] sm:$0xff]  ;;  %v3788_v19 = vld [vmem:[%s4394_s1 + $0x40] sm:$0xff] }
  0xf7   :  { %v1568_v5 = vsel %vm1538_vm2, %v1529_v58, 0.0  ;;  %v1510_v26 = vsub.f32 %v1462_v23, %v1486_v36  ;;  %v1532_v15 = vand.u32 2147483647, %v1508_v3  ;;  %v1570_v18 = vsel %vm1538_vm2, %v1530_v21, 0.0  ;;  %v3793_v38 = vld [vmem:[%s4394_s1 + $0x48] sm:$0xff]  ;;  %v3798_v11 = vld [vmem:[%s4394_s1 + $0x50] sm:$0xff] }
  0xf8   :  { %v1565_v55 = vadd.f32 %v1564_v29, %v1563_v42  ;;  %v501_v22 = vadd.f32 %v500_v46, %v498_v12  ;;  %v1511_v63 = vsub.f32 %v1463_v6, %v1487_v45  ;;  %v1533_v59 = vand.u32 2147483647, %v1509_v8  ;;  %v3803_v54 = vld [vmem:[%s4394_s1 + $0x58] sm:$0xff]  ;;  %v3808_v25 = vld [vmem:[%s4394_s1 + $0x60] sm:$0xff]  ;;  %v3813_v58 = vld [vmem:[%s4394_s1 + $0x68] sm:$0xff] }
  0xf9   :  { %v1572_v37 = vsel %vm1538_vm2, %v1531_v31, 0.0  ;;  %v1512_v43 = vsub.f32 %v1464_v33, %v1488_v57  ;;  %v1534_v24 = vand.u32 2147483647, %v1510_v26  ;;  %v1574_v2 = vsel %vm1538_vm2, %v1532_v15, 0.0  ;;  %v3818_v29 = vld [vmem:[%s4394_s1 + $0x70] sm:$0xff]  ;;  %v3825_v12 = vld [vmem:[%s4394_s1 + $0x78] sm:$0xff] }
  0xfa   :  { %v1567_v7 = vadd.f32 %v1566_v60, %v1565_v55  ;;  %502 = vadd.xlane.f32.xlu0 %v501_v22  ;;  %v1513_v13 = vsub.f32 %v1465_v1, %v1489_v35  ;;  %v1535_v39 = vand.u32 2147483647, %v1511_v63  ;;  %v1576_v41 = vsel %vm1538_vm2, %v1533_v59, 0.0  ;;  %v3830_v3 = vld [vmem:[%s4394_s1 + $0x80] sm:$0xff]  ;;  %v3835_v21 = vld [vmem:[%s4394_s1 + $0x88] sm:$0xff]  ;;  %v3844_v22 = vld [vmem:[%s4394_s1 + $0x90] sm:$0xff] }
  0xfb   :  { %v1536_v49 = vand.u32 2147483647, %v1512_v43  ;;  %v1578_v48 = vsel %vm1538_vm2, %v1534_v24, 0.0  ;;  %v536_v46 = vmax.f32 %v512_v50, 0.0  ;;  %v537_v44 = vmax.f32 %v513_v9, 0.0  ;;  %v3849_v8 = vld [vmem:[%s4394_s1 + $0x98] sm:$0xff] }
  0xfc   :  { %v1569_v27 = vadd.f32 %v1568_v5, %v1567_v7  ;;  %v1537_v34 = vand.u32 2147483647, %v1513_v13  ;;  %v1580_v56 = vsel %vm1538_vm2, %v1535_v39, 0.0  ;;  %v538_v10 = vmax.f32 %v3758_v16, 0.0  ;;  %v3858_v7 = vld [vmem:[%s4394_s1 + $0xa0] sm:$0xff]  ;;  %v3879_v35 = vld [vmem:[%s4394_s1 + $0xb0] sm:$0xff] }
  0xfd   :  { %v1582_v28 = vsel %vm1538_vm2, %v1536_v49, 0.0  ;;  %v539_v42 = vmax.f32 %v3763_v52, 0.0  ;;  %v540_v60 = vmax.f32 %v3768_v47, 0.0  ;;  %v541_v23 = vmax.f32 %v3773_v4, 0.0  ;;  %v3863_v26 = vld [vmem:[%s4394_s1 + $0xb8] sm:$0x3] }
  0xfe   :  { %v1571_v51 = vadd.f32 %v1570_v18, %v1569_v27  ;;  %v1584_v14 = vsel %vm1538_vm2, %v1537_v34, 0.0  ;;  %v542_v36 = vmax.f32 %v3778_v53, 0.0  ;;  %v543_v55 = vmax.f32 %v3783_v17, 0.0  ;;  %4723 = vst [vmem:[#allocation27_spill] sm:$0xff] %v3863_v26  ;;  %v3871_v27 = vld [vmem:[%s4394_s1 + $0xa8] sm:$0xff]  ;;  %4725 = vst [vmem:[#allocation5_spill] sm:$0xff] %v3879_v35 }
  0xff   :  { %v544_v31 = vmax.f32 %v3788_v19, 0.0  ;;  %v545_v5 = vmax.f32 %v3793_v38, 0.0  ;;  %v546_v6 = vmax.f32 %v3798_v11, 0.0  ;;  %v547_v45 = vmax.f32 %v3803_v54, 0.0  ;;  %4724 = vst [vmem:[#allocation50_spill] sm:$0xff] %v3871_v27 }
 0x100   :  { %v1573_v61 = vadd.f32 %v1572_v37, %v1571_v51  ;;  %v548_v15 = vmax.f32 %v3808_v25, 0.0  ;;  %v549_v18 = vmax.f32 %v3813_v58, 0.0  ;;  %v550_v33 = vmax.f32 %v3818_v29, 0.0 }
 0x101   :  { %v584_v57 = vand.u32 2147483647, %v512_v50  ;;  %v551_v63 = vmax.f32 %v3825_v12, 0.0  ;;  %v552_v59 = vmax.f32 %v3830_v3, 0.0  ;;  %v553_v37 = vmax.f32 %v3835_v21, 0.0 }
 0x102   :  { %v1575_v40 = vadd.f32 %v1574_v2, %v1573_v61  ;;  %v585_v1 = vand.u32 2147483647, %v513_v9  ;;  %v554_v51 = vmax.f32 %v3844_v22, 0.0  ;;  %v555_v43 = vmax.f32 %v3849_v8, 0.0 }
 0x103   :  { %v556_v24 = vmax.f32 %v3858_v7, 0.0  ;;  %v586_v2 = vand.u32 2147483647, %v3758_v16  ;;  %v3891_v49 = vsub.f32 %v537_v44, %v513_v9  ;;  %v3895_v34 = vsub.f32 %v538_v10, %v3758_v16 }
 0x104   :  { %v1577_v32 = vadd.f32 %v1576_v41, %v1575_v40  ;;  %v587_v41 = vand.u32 2147483647, %v3763_v52  ;;  %v3889_v40 = vsub.f32 %v536_v46, %v512_v50  ;;  %v3909_v9 = vsub.f32 %v542_v36, %v3778_v53 }
 0x105   :  { %v610_v50 = vsub.f32 0.0, %v586_v2  ;;  %v3912_v16 = vsub.f32 %v543_v55, %v3783_v17  ;;  %v3916_v46 = vsub.f32 %v544_v31, %v3788_v19  ;;  %v3920_v10 = vsub.f32 %v545_v5, %v3793_v38 }
 0x106   :  { %v1579_v62 = vadd.f32 %v1578_v48, %v1577_v32  ;;  %v588_v48 = vand.u32 2147483647, %v3768_v47  ;;  %v608_v32 = vsub.f32 0.0, %v584_v57  ;;  %v3928_v31 = vsub.f32 %v547_v45, %v3803_v54 }
 0x107   :  { %4726 = vst [vmem:[#allocation51_spill] sm:$0xff] %v3916_v46  ;;  %4727 = vst [vmem:[#allocation6_spill] sm:$0xff] %v3920_v10  ;;  %v636_v55 = vmul.f32 1.442695, %v610_v50  ;;  %v596_v5 = vand.u32 2147483647, %v3808_v25 }
 0x108   :  { %v1581_v0 = vadd.f32 %v1580_v56, %v1579_v62  ;;  %v3898_v56 = vsub.f32 %v539_v42, %v3763_v52  ;;  %v589_v62 = vand.u32 2147483647, %v3773_v4  ;;  %v591_v52 = vand.u32 2147483647, %v3783_v17  ;;  %4729 = vst [vmem:[#allocation8_spill] sm:$0xff] %v3928_v31 }
 0x109   :  { %v612_v44 = vsub.f32 0.0, %v588_v48  ;;  %v593_v42 = vand.u32 2147483647, %v3793_v38  ;;  %v594_v17 = vand.u32 2147483647, %v3798_v11  ;;  %v620_v50 = vsub.f32 0.0, %v596_v5 }
 0x10a   :  { %v1583_v30 = vadd.f32 %v1582_v28, %v1581_v0  ;;  %v609_v28 = vsub.f32 0.0, %v585_v1  ;;  %v3902_v0 = vsub.f32 %v540_v60, %v3768_v47  ;;  %v592_v47 = vand.u32 2147483647, %v3788_v19 }
 0x10b   :  { %v595_v19 = vand.u32 2147483647, %v3803_v54  ;;  %v615_v57 = vsub.f32 0.0, %v591_v52  ;;  %v640_v38 = vmul.f32 1.442695, %v612_v44 }
 0x10c   :  { %v1585_v20 = vadd.f32 %v1584_v14, %v1583_v30  ;;  %v3905_v14 = vsub.f32 %v541_v23, %v3773_v4  ;;  %v590_v30 = vand.u32 2147483647, %v3778_v53  ;;  %v632_v4 = vmul.f32 1.442695, %v608_v32 }
 0x10d   :  { %v613_v53 = vsub.f32 0.0, %v589_v62  ;;  %v634_v60 = vmul.f32 1.442695, %v609_v28  ;;  %v3924_v23 = vsub.f32 %v546_v6, %v3798_v11  ;;  %v616_v2 = vsub.f32 0.0, %v592_v47 }
 0x10e   :  { %1586 = vadd.xlane.f32.xlu1 %v1585_v20  ;;  %v611_v20 = vsub.f32 0.0, %v587_v41  ;;  %v614_v36 = vsub.f32 0.0, %v590_v30  ;;  %1820 = vpow2.f32 %v632_v4  ;;  %v597_v41 = vand.u32 2147483647, %v3813_v58 }
 0x10f   :  { %4728 = vst [vmem:[#allocation7_spill] sm:$0xff] %v3924_v23  ;;  %v617_v6 = vsub.f32 0.0, %v593_v42  ;;  %1822 = vpow2.f32 %v634_v60  ;;  %v642_v48 = vmul.f32 1.442695, %v613_v53  ;;  %v598_v11 = vand.u32 2147483647, %v3818_v29 }
 0x110   :  { %v638_v1 = vmul.f32 1.442695, %v611_v20  ;;  %v618_v32 = vsub.f32 0.0, %v594_v17  ;;  %1824 = vpow2.f32 %v636_v55  ;;  %v644_v45 = vmul.f32 1.442695, %v614_v36 }
 0x111   :  { %v599_v62 = vand.u32 2147483647, %v3825_v12  ;;  %v619_v54 = vsub.f32 0.0, %v595_v19  ;;  %v646_v28 = vmul.f32 1.442695, %v615_v57  ;;  %v621_v47 = vsub.f32 0.0, %v597_v41 }
 0x112   :  { %1826 = vpow2.f32 %v638_v1  ;;  %v600_v30 = vand.u32 2147483647, %v3830_v3  ;;  %v648_v52 = vmul.f32 1.442695, %v616_v2  ;;  %v601_v20 = vand.u32 2147483647, %v3835_v21 }
 0x113   :  { %1828 = vpow2.f32 %v640_v38  ;;  %v650_v44 = vmul.f32 1.442695, %v617_v6  ;;  %v602_v4 = vand.u32 2147483647, %v3844_v22  ;;  %v622_v42 = vsub.f32 0.0, %v598_v11 }
 0x114   :  { %1830 = vpow2.f32 %v642_v48  ;;  %v652_v53 = vmul.f32 1.442695, %v618_v32  ;;  %v603_v60 = vand.u32 2147483647, %v3849_v8  ;;  %v623_v17 = vsub.f32 0.0, %v599_v62 }
 0x115   :  { %1832 = vpow2.f32 %v644_v45  ;;  %v654_v36 = vmul.f32 1.442695, %v619_v54  ;;  %v604_v55 = vand.u32 2147483647, %v3858_v7  ;;  %v624_v19 = vsub.f32 0.0, %v600_v30 }
 0x116   :  { %1834 = vpow2.f32 %v646_v28  ;;  %v656_v57 = vmul.f32 1.442695, %v620_v50  ;;  %v605_v1 = vand.u32 2147483647, %v3871_v27  ;;  %v625_v5 = vsub.f32 0.0, %v601_v20 }
 0x117   :  { %1836 = vpow2.f32 %v648_v52  ;;  %v658_v2 = vmul.f32 1.442695, %v621_v47  ;;  %v606_v41 = vand.u32 2147483647, %v3879_v35  ;;  %v626_v6 = vsub.f32 0.0, %v602_v4 }
 0x118   :  { %1838 = vpow2.f32 %v650_v44  ;;  %v3941_v38 = vpop.eup %1820  ;;  %v660_v48 = vmul.f32 1.442695, %v622_v42  ;;  %v3949_v32 = vsub.f32 %v548_v15, %v3808_v25  ;;  %v627_v45 = vsub.f32 0.0, %v603_v60 }
 0x119   :  { %1840 = vpow2.f32 %v652_v53  ;;  %v3944_v11 = vpop.eup %1822  ;;  %v662_v62 = vmul.f32 1.442695, %v623_v17  ;;  %v607_v28 = vand.u32 2147483647, %v3863_v26  ;;  %v628_v30 = vsub.f32 0.0, %v604_v55 }
 0x11a   :  { %4730 = vst [vmem:[#allocation20_spill] sm:$0xff] %v3949_v32  ;;  %1842 = vpow2.f32 %v654_v36  ;;  %v3951_v54 = vpop.eup %1824  ;;  %v664_v50 = vmul.f32 1.442695, %v624_v19  ;;  %v3959_v20 = vsub.f32 %v549_v18, %v3813_v58  ;;  %v629_v47 = vsub.f32 0.0, %v605_v1 }
 0x11b   :  { %1844 = vpow2.f32 %v656_v57  ;;  %v666_v25 = vmul.f32 1.442695, %v625_v5  ;;  %v3966_v44 = vsub.f32 %v550_v33, %v3818_v29  ;;  %v630_v4 = vsub.f32 0.0, %v606_v41 }
 0x11c   :  { %v3954_v52 = vpop.eup %1826  ;;  %4731 = vst [vmem:[#allocation23_spill] sm:$0xff] %v3959_v20  ;;  %1846 = vpow2.f32 %v658_v2  ;;  %v668_v42 = vmul.f32 1.442695, %v626_v6  ;;  %v3973_v58 = vsub.f32 %v551_v63, %v3825_v12  ;;  %v3978_v18 = vsub.f32 %v552_v59, %v3830_v3 }
 0x11d   :  { %v3961_v15 = vpop.eup %1828  ;;  %4732 = vst [vmem:[#allocation21_spill] sm:$0xff] %v3966_v44  ;;  %1848 = vpow2.f32 %v660_v48  ;;  %v670_v60 = vmul.f32 1.442695, %v627_v45  ;;  %v631_v29 = vsub.f32 0.0, %v607_v28  ;;  %v672_v33 = vmul.f32 1.442695, %v628_v30 }
 0x11e   :  { %v3968_v53 = vpop.eup %1830  ;;  %4733 = vst [vmem:[#allocation24_spill] sm:$0xff] %v3973_v58  ;;  %4734 = vst [vmem:[#allocation25_spill] sm:$0xff] %v3978_v18  ;;  %1850 = vpow2.f32 %v662_v62  ;;  %v683_v36 = vmul.f32 -0.5, %v3941_v38  ;;  %v3988_v12 = vsub.f32 %v553_v37, %v3835_v21  ;;  %v674_v63 = vmul.f32 1.442695, %v629_v47 }
 0x11f   :  { %v3980_v17 = vpop.eup %1832  ;;  %1852 = vpow2.f32 %v664_v50  ;;  %v692_v3 = vmul.f32 -0.5, %v3944_v11  ;;  %v3996_v19 = vsub.f32 %v554_v51, %v3844_v22  ;;  %v4001_v57 = vsub.f32 %v555_v43, %v3849_v8 }
 0x120   :  { %v3983_v55 = vpop.eup %1834  ;;  %4735 = vst [vmem:[#allocation26_spill] sm:$0xff] %v3988_v12  ;;  %1854 = vpow2.f32 %v666_v25  ;;  %v676_v1 = vmul.f32 1.442695, %v630_v4  ;;  %v4008_v37 = vsub.f32 %v556_v24, %v3858_v7  ;;  %v680_v5 = vadd.f32 1.0, %v3941_v38 }
 0x121   :  { %v3991_v59 = vpop.eup %1836  ;;  %4736 = vst [vmem:[#allocation9_spill] sm:$0xff] %v3996_v19  ;;  %4737 = vst [vmem:[#allocation28_spill] sm:$0xff] %v4001_v57  ;;  %1856 = vpow2.f32 %v668_v42  ;;  %v701_v22 = vmul.f32 -0.5, %v3951_v54  ;;  %v678_v2 = vmul.f32 1.442695, %v631_v29  ;;  %v684_v8 = vadd.f32 1.0, %v683_v36 }
 0x122   :  { %v4003_v21 = vpop.eup %1838  ;;  %4738 = vst [vmem:[#allocation29_spill] sm:$0xff] %v4008_v37  ;;  %1858 = vpow2.f32 %v670_v60  ;;  %v689_v43 = vadd.f32 1.0, %v3944_v11  ;;  %v693_v6 = vadd.f32 1.0, %v692_v3  ;;  %v698_v48 = vadd.f32 1.0, %v3951_v54 }
 0x123   :  { %v4012_v51 = vpop.eup %1840  ;;  %1860 = vpow2.f32 %v672_v33  ;;  %v710_v7 = vmul.f32 -0.5, %v3954_v52  ;;  %v686_v45 = vand.u32 2147483647, %v3941_v38  ;;  %v707_v62 = vadd.f32 1.0, %v3954_v52 }
 0x124   :  { %v4015_v41 = vpop.eup %1842  ;;  %1862 = vpow2.f32 %v674_v63  ;;  %v719_v28 = vmul.f32 -0.5, %v3961_v15  ;;  %v695_v50 = vand.u32 2147483647, %v3944_v11  ;;  %v702_v47 = vadd.f32 1.0, %v701_v22 }
 0x125   :  { %v4019_v24 = vpop.eup %1844  ;;  %1864 = vpow2.f32 %v676_v1  ;;  %v716_v25 = vadd.f32 1.0, %v3961_v15  ;;  %v4031_v42 = vmul.f32 %v3941_v38, %v684_v8  ;;  %v704_v60 = vand.u32 2147483647, %v3951_v54 }
 0x126   :  { %v4024_v30 = vpop.eup %1846  ;;  %1866 = vlog2.f32 %v680_v5  ;;  %v725_v29 = vadd.f32 1.0, %v3968_v53  ;;  %v4038_v36 = vmul.f32 %v3944_v11, %v693_v6  ;;  %v711_v63 = vadd.f32 1.0, %v710_v7 }
 0x127   :  { %v4028_v4 = vpop.eup %1848  ;;  %1868 = vlog2.f32 %v689_v43  ;;  %v713_v3 = vand.u32 2147483647, %v3954_v52  ;;  %v720_v5 = vadd.f32 1.0, %v719_v28  ;;  %v728_v38 = vmul.f32 -0.5, %v3968_v53 }
 0x128   :  { %v4035_v33 = vpop.eup %1850  ;;  %1870 = vlog2.f32 %v698_v48  ;;  %v734_v22 = vadd.f32 1.0, %v3980_v17  ;;  %v4048_v43 = vmul.f32 %v3951_v54, %v702_v47  ;;  %v737_v11 = vmul.f32 -0.5, %v3980_v17 }
 0x129   :  { %v4041_v1 = vpop.eup %1852  ;;  %1872 = vlog2.f32 %v707_v62  ;;  %v743_v6 = vadd.f32 1.0, %v3983_v55  ;;  %v722_v7 = vand.u32 2147483647, %v3961_v15  ;;  %v746_v62 = vmul.f32 -0.5, %v3983_v55 }
 0x12a   :  { %v4045_v8 = vpop.eup %1854  ;;  %1874 = vlog2.f32 %v716_v25  ;;  %v752_v28 = vadd.f32 1.0, %v3991_v59  ;;  %v4060_v54 = vmul.f32 %v3954_v52, %v711_v63  ;;  %v755_v47 = vmul.f32 -0.5, %v3991_v59 }
 0x12b   :  { %v4052_v48 = vpop.eup %1856  ;;  %1876 = vlog2.f32 %v725_v29  ;;  %v761_v25 = vadd.f32 1.0, %v4003_v21  ;;  %v4067_v61 = vmul.f32 %v3961_v15, %v720_v5  ;;  %v729_v29 = vadd.f32 1.0, %v728_v38 }
 0x12c   :  { %v4057_v39 = vpop.eup %1858  ;;  %1878 = vpow2.f32 %v678_v2  ;;  %v731_v26 = vand.u32 2147483647, %v3968_v53  ;;  %vm4072_vm6 = vcmp.lt.f32.partialorder %v686_v45, 0.0004427343  ;;  %vm4076_vm8 = vcmp.lt.f32.partialorder %v695_v50, 0.0004427343 }
 0x12d   :  { %v4064_v13 = vpop.eup %1860  ;;  %1880 = vlog2.f32 %v734_v22  ;;  %v738_v63 = vadd.f32 1.0, %v737_v11  ;;  %v740_v35 = vand.u32 2147483647, %v3980_v17  ;;  %v770_v15 = vadd.f32 1.0, %v4012_v51 }
 0x12e   :  { %v4070_v37 = vpop.eup %1862  ;;  %1882 = vlog2.f32 %v743_v6  ;;  %vm4084_vm9 = vcmp.lt.f32.partialorder %v704_v60, 0.0004427343  ;;  %v747_v45 = vadd.f32 1.0, %v746_v62  ;;  %v764_v22 = vmul.f32 -0.5, %v4003_v21 }
 0x12f   :  { %4739 = vst [vmem:[#allocation10_spill] sm:$0xff] %v4070_v37  ;;  %v4082_v5 = vpop.eup %1864  ;;  %1884 = vlog2.f32 %v752_v28  ;;  %v779_v50 = vadd.f32 1.0, %v4015_v41  ;;  %vm4090_vm10 = vcmp.lt.f32.partialorder %v713_v3, 0.0004427343  ;;  %v749_v6 = vand.u32 2147483647, %v3983_v55 }
 0x130   :  { %4744 = vst [vmem:[#allocation30_spill] sm:$0xff] %v4082_v5  ;;  %v1867_v57 = vpop.eup %1866  ;;  %v756_v27 = vadd.f32 1.0, %v755_v47  ;;  %1886 = vlog2.f32 %v761_v25  ;;  %v773_v60 = vmul.f32 -0.5, %v4012_v51  ;;  %vm4096_vm11 = vcmp.lt.f32.partialorder %v722_v7, 0.0004427343 }
 0x131   :  { %v1869_v19 = vpop.eup %1868  ;;  %vm4100_vm13 = vcmp.lt.f32.partialorder %v731_v26, 0.0004427343  ;;  %v758_v3 = vand.u32 2147483647, %v3991_v59  ;;  %v782_v28 = vmul.f32 -0.5, %v4015_v41  ;;  %v791_v18 = vmul.f32 -0.5, %v4019_v24 }
 0x132   :  { %v1871_v58 = vpop.eup %1870  ;;  %v4108_v47 = vmul.f32 %v3968_v53, %v729_v29  ;;  %v4111_v25 = vmul.f32 %v3980_v17, %v738_v63  ;;  %1888 = vlog2.f32 %v770_v15  ;;  %v788_v7 = vadd.f32 1.0, %v4019_v24 }
 0x133   :  { %v1873_v26 = vpop.eup %1872  ;;  %v4115_v44 = vmul.f32 %v3983_v55, %v747_v45  ;;  %v765_v20 = vadd.f32 1.0, %v764_v22  ;;  %v767_v32 = vand.u32 2147483647, %v4003_v21  ;;  %1890 = vlog2.f32 %v779_v50 }
 0x134   :  { %v1875_v31 = vpop.eup %1874  ;;  %vm4118_vm14 = vcmp.lt.f32.partialorder %v740_v35, 0.0004427343  ;;  %vm4122_vm15 = vcmp.lt.f32.partialorder %v749_v6, 0.0004427343  ;;  %v4127_v17 = vmul.f32 %v3991_v59, %v756_v27  ;;  %v774_v29 = vadd.f32 1.0, %v773_v60 }
 0x135   :  { %v776_v55 = vand.u32 2147483647, %v4012_v51  ;;  %v785_v63 = vand.u32 2147483647, %v4015_v41  ;;  %v1877_v15 = vpop.eup %1876  ;;  %v682_v45 = vmul.f32 0.6931472, %v1867_v57  ;;  %1892 = vlog2.f32 %v788_v7 }
 0x136   :  { %v691_v22 = vmul.f32 0.6931472, %v1869_v19  ;;  %vm4131_vm0 = vcmp.lt.f32.partialorder %v758_v3, 0.0004427343  ;;  %v783_v50 = vadd.f32 1.0, %v782_v28  ;;  %v792_v6 = vadd.f32 1.0, %v791_v18  ;;  %v4135_v5 = vpop.eup %1878 }
 0x137   :  { %v700_v10 = vmul.f32 0.6931472, %v1871_v58  ;;  %v797_v27 = vadd.f32 1.0, %v4024_v30  ;;  %v800_v59 = vmul.f32 -0.5, %v4024_v30  ;;  %v1881_v60 = vpop.eup %1880  ;;  %v709_v37 = vmul.f32 0.6931472, %v1873_v26 }
 0x138   :  { %v4140_v46 = vmul.f32 %v4003_v21, %v765_v20  ;;  %vm4142_vm1 = vcmp.lt.f32.partialorder %v767_v32, 0.0004427343  ;;  %v794_v57 = vand.u32 2147483647, %v4019_v24  ;;  %v1883_v18 = vpop.eup %1882  ;;  %v718_v3 = vmul.f32 0.6931472, %v1875_v31 }
 0x139   :  { %v727_v28 = vmul.f32 0.6931472, %v1877_v15  ;;  %v4148_v58 = vmul.f32 %v4012_v51, %v774_v29  ;;  %vm4150_vm2 = vcmp.lt.f32.partialorder %v776_v55, 0.0004427343  ;;  %v809_v26 = vmul.f32 -0.5, %v4028_v4  ;;  %v1885_v20 = vpop.eup %1884 }
 0x13a   :  { %v688_v32 = vsel %vm4072_vm6, %v4031_v42, %v682_v45  ;;  %v697_v21 = vsel %vm4076_vm8, %v4038_v36, %v691_v22  ;;  %v4162_v31 = vmul.f32 %v4015_v41, %v783_v50  ;;  %vm4164_vm3 = vcmp.lt.f32.partialorder %v785_v63, 0.0004427343  ;;  %v1887_v55 = vpop.eup %1886 }
 0x13b   :  { %v4169_v29 = vmul.f32 %v4019_v24, %v792_v6  ;;  %v706_v2 = vsel %vm4084_vm9, %v4048_v43, %v700_v10  ;;  %1894 = vlog2.f32 %v797_v27  ;;  %v801_v42 = vadd.f32 1.0, %v800_v59 }
 0x13c   :  { %v806_v52 = vadd.f32 1.0, %v4028_v4  ;;  %v715_v41 = vsel %vm4090_vm10, %v4060_v54, %v709_v37  ;;  %v736_v36 = vmul.f32 0.6931472, %v1881_v60  ;;  %v745_v63 = vmul.f32 0.6931472, %v1883_v18  ;;  %v1889_v45 = vpop.eup %1888 }
 0x13d   :  { %v803_v15 = vand.u32 2147483647, %v4024_v30  ;;  %v724_v24 = vsel %vm4096_vm11, %v4067_v61, %v718_v3  ;;  %v733_v10 = vsel %vm4100_vm13, %v4108_v47, %v727_v28  ;;  %v4185_v43 = vmul.f32 0.6931472, %v1885_v20  ;;  %v1891_v54 = vpop.eup %1890 }
 0x13e   :  { %vm4187_vm4 = vcmp.lt.f32.partialorder %v794_v57, 0.0004427343  ;;  %v810_v37 = vadd.f32 1.0, %v809_v26  ;;  %v4191_v11 = vmul.f32 0.6931472, %v1887_v55  ;;  %v815_v22 = vadd.f32 1.0, %v4035_v33 }
 0x13f   :  { %v818_v50 = vmul.f32 -0.5, %v4035_v33  ;;  %v896_v61 = vadd.f32 %v688_v32, %v3889_v40  ;;  %v4197_v12 = vmul.f32 %v4024_v30, %v801_v42  ;;  %1896 = vlog2.f32 %v806_v52  ;;  %v1893_v60 = vpop.eup %1892 }
 0x140   :  { %v897_v62 = vadd.f32 %v697_v21, %v3891_v49  ;;  %v898_v47 = vadd.f32 %v706_v2, %v3895_v34  ;;  %v742_v6 = vsel %vm4118_vm14, %v4111_v25, %v736_v36  ;;  %v751_v27 = vsel %vm4122_vm15, %v4115_v44, %v745_v63 }
 0x141   :  { %v4207_v59 = vmul.f32 0.6931472, %v1889_v45  ;;  %v812_v40 = vand.u32 2147483647, %v4028_v4  ;;  %v760_v49 = vsel %vm4131_vm0, %v4127_v17, %v4185_v43  ;;  %v4214_v30 = vmul.f32 0.6931472, %v1891_v54 }
 0x142   :  { %v4217_v34 = vmul.f32 %v4028_v4, %v810_v37  ;;  %v899_v23 = vadd.f32 %v715_v41, %v3898_v56  ;;  %v769_v44 = vsel %vm4142_vm1, %v4140_v46, %v4191_v11  ;;  %1898 = vlog2.f32 %v815_v22  ;;  %v4773_v37 = vld [vmem:[#allocation51_spill] sm:$0xff] }
 0x143   :  { %v819_v25 = vadd.f32 1.0, %v818_v50  ;;  %v920_v53 = vsel %vm453_vm12, %v896_v61, 0.0  ;;  %vm4225_vm5 = vcmp.lt.f32.partialorder %v803_v15, 0.0004427343  ;;  %v824_v17 = vadd.f32 1.0, %v4041_v1 }
 0x144   :  { %v900_v4 = vadd.f32 %v724_v24, %v3902_v0  ;;  %v921_v35 = vsel %vm453_vm12, %v897_v62, 0.0  ;;  %v923_v56 = vsel %vm453_vm12, %v898_v47, 0.0  ;;  %v778_v46 = vsel %vm4150_vm2, %v4148_v58, %v4207_v59  ;;  %v4777_v59 = vld [vmem:[#allocation6_spill] sm:$0xff] }
 0x145   :  { %v4237_v19 = vmul.f32 0.6931472, %v1893_v60  ;;  %v821_v18 = vand.u32 2147483647, %v4035_v33  ;;  %v922_v3 = vadd.f32 %v921_v35, %v920_v53  ;;  %v1895_v28 = vpop.eup %1894  ;;  %v787_v0 = vsel %vm4164_vm3, %v4162_v31, %v4214_v30 }
 0x146   :  { %vm4244_vm6 = vcmp.lt.f32.partialorder %v812_v40, 0.0004427343  ;;  %v833_v20 = vadd.f32 1.0, %v4045_v8  ;;  %v901_v7 = vadd.f32 %v733_v10, %v3905_v14  ;;  %v925_v58 = vsel %vm453_vm12, %v899_v23, 0.0 }
 0x147   :  { %v4252_v32 = vmul.f32 %v4035_v33, %v819_v25  ;;  %v827_v21 = vmul.f32 -0.5, %v4041_v1  ;;  %v830_v55 = vand.u32 2147483647, %v4041_v1  ;;  %v924_v2 = vadd.f32 %v923_v56, %v922_v3 }
 0x148   :  { %1900 = vlog2.f32 %v824_v17  ;;  %v842_v31 = vadd.f32 1.0, %v4052_v48  ;;  %v902_v51 = vadd.f32 %v742_v6, %v3909_v9  ;;  %v927_v42 = vsel %vm453_vm12, %v900_v4, 0.0  ;;  %v4776_v6 = vld [vmem:[#allocation10_spill] sm:$0xff] }
 0x149   :  { %v796_v14 = vsel %vm4187_vm4, %v4169_v29, %v4237_v19  ;;  %v4263_v52 = vmul.f32 0.6931472, %v1895_v28  ;;  %v836_v33 = vmul.f32 -0.5, %v4045_v8  ;;  %v926_v41 = vadd.f32 %v925_v58, %v924_v2  ;;  %v1897_v36 = vpop.eup %1896  ;;  %v4780_v17 = vld [vmem:[#allocation30_spill] sm:$0xff]  ;;  %v4785_v2 = vld [vmem:[#allocation20_spill] sm:$0xff] }
 0x14a   :  { %1902 = vlog2.f32 %v833_v20  ;;  %v851_v63 = vadd.f32 1.0, %v4057_v39  ;;  %v903_v15 = vadd.f32 %v751_v27, %v3912_v16  ;;  %v929_v9 = vsel %vm453_vm12, %v901_v7, 0.0  ;;  %v4784_v20 = vld [vmem:[#allocation8_spill] sm:$0xff] }
 0x14b   :  { %v828_v45 = vadd.f32 1.0, %v827_v21  ;;  %v839_v24 = vand.u32 2147483647, %v4045_v8  ;;  %v845_v10 = vmul.f32 -0.5, %v4052_v48  ;;  %v928_v43 = vadd.f32 %v927_v42, %v926_v41 }
 0x14c   :  { %vm4271_vm8 = vcmp.lt.f32.partialorder %v821_v18, 0.0004427343  ;;  %1904 = vlog2.f32 %v842_v31  ;;  %v860_v38 = vadd.f32 1.0, %v4064_v13  ;;  %v904_v54 = vadd.f32 %v760_v49, %v4773_v37  ;;  %v1899_v16 = vpop.eup %1898  ;;  %v4789_v37 = vld [vmem:[#allocation21_spill] sm:$0xff] }
 0x14d   :  { %v931_v11 = vsel %vm453_vm12, %v902_v51, 0.0  ;;  %v808_v22 = vmul.f32 0.6931472, %v1897_v36  ;;  %v837_v50 = vadd.f32 1.0, %v836_v33  ;;  %v848_v61 = vand.u32 2147483647, %v4052_v48 }
 0x14e   :  { %v930_v62 = vadd.f32 %v929_v9, %v928_v43  ;;  %vm4279_vm9 = vcmp.lt.f32.partialorder %v830_v55, 0.0004427343  ;;  %1906 = vlog2.f32 %v851_v63  ;;  %v869_v27 = vadd.f32 1.0, %v4776_v6  ;;  %v4786_v63 = vld [vmem:[#allocation23_spill] sm:$0xff] }
 0x14f   :  { %v905_v40 = vadd.f32 %v769_v44, %v4777_v59  ;;  %v933_v60 = vsel %vm453_vm12, %v903_v15, 0.0  ;;  %v805_v49 = vsel %vm4225_vm5, %v4197_v12, %v4263_v52  ;;  %v829_v30 = vmul.f32 %v4041_v1, %v828_v45  ;;  %v4781_v44 = vld [vmem:[#allocation7_spill] sm:$0xff] }
 0x150   :  { %v854_v23 = vmul.f32 -0.5, %v4057_v39  ;;  %v932_v25 = vadd.f32 %v931_v11, %v930_v62  ;;  %vm4292_vm10 = vcmp.lt.f32.partialorder %v839_v24, 0.0004427343  ;;  %1908 = vlog2.f32 %v860_v38  ;;  %v4803_v24 = vld [vmem:[#allocation5_spill] sm:$0xff] }
 0x151   :  { %v878_v4 = vadd.f32 1.0, %v4780_v17  ;;  %v906_v35 = vadd.f32 %v778_v46, %v4781_v44  ;;  %v935_v56 = vsel %vm453_vm12, %v904_v54, 0.0  ;;  %v814_v12 = vsel %vm4244_vm6, %v4217_v34, %v808_v22 }
 0x152   :  { %v838_v1 = vmul.f32 %v4045_v8, %v837_v50  ;;  %v846_v57 = vadd.f32 1.0, %v845_v10  ;;  %v934_v19 = vadd.f32 %v933_v60, %v932_v25  ;;  %v1901_v18 = vpop.eup %1900  ;;  %vm4303_vm11 = vcmp.lt.f32.partialorder %v848_v61, 0.0004427343 }
 0x153   :  { %1910 = vlog2.f32 %v869_v27  ;;  %v887_v28 = vadd.f32 1.0, %v4135_v5  ;;  %v907_v46 = vadd.f32 %v787_v0, %v4784_v20  ;;  %v937_v7 = vsel %vm453_vm12, %v905_v40, 0.0  ;;  %v4792_v27 = vld [vmem:[#allocation24_spill] sm:$0xff] }
 0x154   :  { %v817_v58 = vmul.f32 0.6931472, %v1899_v16  ;;  %v855_v21 = vadd.f32 1.0, %v854_v23  ;;  %v857_v34 = vand.u32 2147483647, %v4057_v39  ;;  %v936_v26 = vadd.f32 %v935_v56, %v934_v19  ;;  %v1903_v8 = vpop.eup %1902 }
 0x155   :  { %v863_v55 = vmul.f32 -0.5, %v4064_v13  ;;  %1912 = vlog2.f32 %v878_v4  ;;  %v908_v31 = vadd.f32 %v796_v14, %v4785_v2  ;;  %v939_v51 = vsel %vm453_vm12, %v906_v35, 0.0  ;;  %v4793_v4 = vld [vmem:[#allocation25_spill] sm:$0xff] }
 0x156   :  { %v826_v42 = vmul.f32 0.6931472, %v1901_v18  ;;  %v847_v52 = vmul.f32 %v4052_v48, %v846_v57  ;;  %v866_v0 = vand.u32 2147483647, %v4064_v13  ;;  %v938_v33 = vadd.f32 %v937_v7, %v936_v26  ;;  %v1905_v41 = vpop.eup %1904 }
 0x157   :  { %v872_v36 = vmul.f32 -0.5, %v4776_v6  ;;  %1914 = vlog2.f32 %v887_v28  ;;  %v909_v15 = vadd.f32 %v805_v49, %v4786_v63  ;;  %v941_v9 = vsel %vm453_vm12, %v907_v46, 0.0  ;;  %v4794_v28 = vld [vmem:[#allocation26_spill] sm:$0xff] }
 0x158   :  { %v823_v14 = vsel %vm4271_vm8, %v4252_v32, %v817_v58  ;;  %v835_v45 = vmul.f32 0.6931472, %v1903_v8  ;;  %vm4322_vm13 = vcmp.lt.f32.partialorder %v857_v34, 0.0004427343  ;;  %v940_v48 = vadd.f32 %v939_v51, %v938_v33  ;;  %v1907_v10 = vpop.eup %1906 }
 0x159   :  { %v856_v43 = vmul.f32 %v4057_v39, %v855_v21  ;;  %v864_v38 = vadd.f32 1.0, %v863_v55  ;;  %v910_v54 = vadd.f32 %v814_v12, %v4789_v37  ;;  %v943_v11 = vsel %vm453_vm12, %v908_v31, 0.0 }
 0x15a   :  { %v832_v16 = vsel %vm4279_vm9, %v829_v30, %v826_v42  ;;  %v844_v22 = vmul.f32 0.6931472, %v1905_v41  ;;  %v881_v32 = vmul.f32 -0.5, %v4780_v17  ;;  %v942_v29 = vadd.f32 %v941_v9, %v940_v48  ;;  %v1909_v50 = vpop.eup %1908 }
 0x15b   :  { %vm4332_vm14 = vcmp.lt.f32.partialorder %v866_v0, 0.0004427343  ;;  %v873_v62 = vadd.f32 1.0, %v872_v36  ;;  %v911_v39 = vadd.f32 %v823_v14, %v4792_v27  ;;  %v945_v59 = vsel %vm453_vm12, %v909_v15, 0.0  ;;  %v4802_v36 = vld [vmem:[#allocation28_spill] sm:$0xff] }
 0x15c   :  { %v841_v40 = vsel %vm4292_vm10, %v838_v1, %v835_v45  ;;  %v853_v60 = vmul.f32 0.6931472, %v1907_v10  ;;  %v890_v47 = vmul.f32 -0.5, %v4135_v5  ;;  %v944_v49 = vadd.f32 %v943_v11, %v942_v29 }
 0x15d   :  { %v1911_v30 = vpop.eup %1910  ;;  %v865_v23 = vmul.f32 %v4064_v13, %v864_v38  ;;  %v875_v25 = vand.u32 2147483647, %v4776_v6  ;;  %v912_v44 = vadd.f32 %v832_v16, %v4793_v4  ;;  %v947_v35 = vsel %vm453_vm12, %v910_v54, 0.0  ;;  %v4806_v16 = vld [vmem:[#allocation27_spill] sm:$0xff] }
 0x15e   :  { %v850_v56 = vsel %vm4303_vm11, %v847_v52, %v844_v22  ;;  %v862_v12 = vmul.f32 0.6931472, %v1909_v50  ;;  %v882_v57 = vadd.f32 1.0, %v881_v32  ;;  %v946_v53 = vadd.f32 %v945_v59, %v944_v49  ;;  %v4798_v52 = vld [vmem:[#allocation50_spill] sm:$0xff] }
 0x15f   :  { %v1913_v1 = vpop.eup %1912  ;;  %v874_v19 = vmul.f32 %v4776_v6, %v873_v62  ;;  %v884_v18 = vand.u32 2147483647, %v4780_v17  ;;  %v913_v20 = vadd.f32 %v841_v40, %v4794_v28  ;;  %v949_v13 = vsel %vm453_vm12, %v911_v39, 0.0  ;;  %v4797_v6 = vld [vmem:[#allocation9_spill] sm:$0xff] }
 0x160   :  { %v859_v46 = vsel %vm4322_vm13, %v856_v43, %v853_v60  ;;  %v871_v7 = vmul.f32 0.6931472, %v1911_v30  ;;  %v891_v58 = vadd.f32 1.0, %v890_v47  ;;  %v948_v21 = vadd.f32 %v947_v35, %v946_v53  ;;  %v4805_v43 = vld [vmem:[#allocation29_spill] sm:$0xff] }
 0x161   :  { %v1915_v3 = vpop.eup %1914  ;;  %vm4353_vm15 = vcmp.lt.f32.partialorder %v875_v25, 0.0004427343  ;;  %v893_v26 = vand.u32 2147483647, %v4135_v5  ;;  %v914_v8 = vadd.f32 %v850_v56, %v4797_v6  ;;  %v951_v55 = vsel %vm453_vm12, %v912_v44, 0.0 }
 0x162   :  { %v868_v2 = vsel %vm4332_vm14, %v865_v23, %v862_v12  ;;  %v880_v31 = vmul.f32 0.6931472, %v1913_v1  ;;  %v883_v51 = vmul.f32 %v4780_v17, %v882_v57  ;;  %v950_v42 = vadd.f32 %v949_v13, %v948_v21  ;;  %v1433_v1 = vpop.xlane.xlu1 %1432 }
 0x163   :  { %v4799_v0 = vmax.f32 %v4798_v52, 0.0  ;;  %vm4366_vm0 = vcmp.lt.f32.partialorder %v884_v18, 0.0004427343  ;;  %v915_v63 = vadd.f32 %v859_v46, %v4802_v36  ;;  %v953_v15 = vsel %vm453_vm12, %v913_v20, 0.0 }
 0x164   :  { %v877_v9 = vsel %vm4353_vm15, %v874_v19, %v871_v7  ;;  %v889_v14 = vmul.f32 0.6931472, %v1915_v3  ;;  %v892_v45 = vmul.f32 %v4135_v5, %v891_v58  ;;  %v952_v17 = vadd.f32 %v951_v55, %v950_v42 }
 0x165   :  { %v581_v33 = vsub.f32 %v4799_v0, %v4798_v52  ;;  %v4804_v48 = vmax.f32 %v4803_v24, 0.0  ;;  %vm894_vm1 = vcmp.lt.f32.partialorder %v893_v26, 0.0004427343  ;;  %v916_v38 = vadd.f32 %v868_v2, %v4805_v43 }
 0x166   :  { %v955_v37 = vsel %vm453_vm12, %v914_v8, 0.0  ;;  %v886_v54 = vsel %vm4366_vm0, %v883_v51, %v880_v31  ;;  %v954_v11 = vadd.f32 %v953_v15, %v952_v17  ;;  %v4807_v22 = vmax.f32 %v4806_v16, 0.0 }
 0x167   :  { %v582_v10 = vsub.f32 %v4804_v48, %v4803_v24  ;;  %v917_v29 = vadd.f32 %v877_v9, %v581_v33  ;;  %v957_v5 = vsel %vm453_vm12, %v915_v63, 0.0  ;;  %v895_v50 = vsel %vm894_vm1, %v892_v45, %v889_v14 }
 0x168   :  { %v583_v32 = vsub.f32 %v4807_v22, %v4806_v16  ;;  %v956_v61 = vadd.f32 %v955_v37, %v954_v11  ;;  %v959_v27 = vsel %vm453_vm12, %v916_v38, 0.0  ;;  %v1434_v28 = vrot.slane %v1433_v1, 4 }
 0x169   :  { %v918_v62 = vadd.f32 %v886_v54, %v582_v10  ;;  %v961_v40 = vsel %vm453_vm12, %v917_v29, 0.0 }
 0x16a   :  { %v958_v39 = vadd.f32 %v957_v5, %v956_v61  ;;  %v919_v59 = vadd.f32 %v895_v50, %v583_v32  ;;  %v1435_v13 = vadd.f32 %v1434_v28, %v1433_v1 }
 0x16b   :  { %v963_v47 = vsel %vm453_vm12, %v918_v62, 0.0 }
 0x16c   :  { %v960_v60 = vadd.f32 %v959_v27, %v958_v39  ;;  %v965_v30 = vsel %vm499_vm7, %v919_v59, 0.0  ;;  %v1436_v58 = vrot.slane %v1435_v13, 2 }
 0x16e   :  { %v962_v49 = vadd.f32 %v961_v40, %v960_v60  ;;  %v1437_v26 = vadd.f32 %v1436_v58, %v1435_v13 }
 0x170   :  { %v964_v23 = vadd.f32 %v963_v47, %v962_v49  ;;  %v1438_v2 = vrot.slane %v1437_v26, 1 }
 0x172   :  { %v966_v25 = vadd.f32 %v965_v30, %v964_v23  ;;  %v1439_v52 = vadd.f32 %v1438_v2, %v1437_v26 }
 0x174   :  { %967 = vadd.xlane.f32.xlu0 %v966_v25 }
 0x187   :  { %v503_v4 = vpop.xlane.xlu0 %502 }
 0x188   :  { %v504_v44 = vrot.slane %v503_v4, 4 }
 0x18a   :  { %v505_v35 = vadd.f32 %v504_v44, %v503_v4 }
 0x18c   :  { %v506_v56 = vrot.slane %v505_v35, 2 }
 0x18e   :  { %v507_v12 = vadd.f32 %v506_v56, %v505_v35 }
 0x190   :  { %v508_v57 = vrot.slane %v507_v12, 1 }
 0x192   :  { %v509_v53 = vadd.f32 %v508_v57, %v507_v12 }
 0x194   :  { %1619 = vpush %v509_v53 }
 0x19b   :  { %v1587_v19 = vpop.xlane.xlu1 %1586 }
 0x19c   :  { %v1588_v18 = vrot.slane %v1587_v19, 4 }
 0x19e   :  { %v1589_v20 = vadd.f32 %v1588_v18, %v1587_v19 }
 0x1a0   :  { %v1590_v46 = vrot.slane %v1589_v20, 2 }
 0x1a2   :  { %v1591_v34 = vadd.f32 %v1590_v46, %v1589_v20 }
 0x1a4   :  { %v1592_v55 = vrot.slane %v1591_v34, 1 }
 0x1a6   :  { %v1593_v42 = vadd.f32 %v1592_v55, %v1591_v34 }
 0x1c5   :  { %s1620_s1 = spop %1619 }
 0x1c6   :  { %s511_s2 = smul.f32 0.00017343045, %s1620_s1 }
 0x201   :  { %v968_v7 = vpop.xlane.xlu0 %967 }
 0x202   :  { %v969_v21 = vrot.slane %v968_v7, 4 }
 0x204   :  { %v970_v3 = vadd.f32 %v969_v21, %v968_v7 }
 0x206   :  { %v971_v6 = vrot.slane %v970_v3, 2 }
 0x208   :  { %v972_v8 = vadd.f32 %v971_v6, %v970_v3 }
 0x20a   :  { %v973_v31 = vrot.slane %v972_v8, 1 }
 0x20c   :  { %v974_v51 = vadd.f32 %v973_v31, %v972_v8 }
 0x20e   :  { %1621 = vpush %v974_v51 }
 0x20f   :  { %1623 = vpush %v1439_v52 }
 0x210   :  { %1625 = vpush %v1593_v42 }
 0x23f   :  { %s1622_s16 = spop %1621 }
 0x240   :  { %s976_s17 = smul.f32 0.00017343045, %s1622_s16  ;;  %s1624_s18 = spop %1623 }
 0x241   :  { %s1626_s19 = spop %1625  ;;  %s1441_s3 = smul.f32 0.00017343045, %s1624_s18 }
 0x242   :  { %s1595_s23 = smul.f32 0.00016276042, %s1626_s19  ;;  %s1600_s24 = sadd.f32 %s976_s17, %s511_s2 }
 0x244   :  { %s1596_s4 = smul.f32 100.0, %s1595_s23 }
 0x245   :  { %s1601_s25 = smul.f32 0.5, %s1600_s24 }
 0x246   :  { %s1597_s26 = sadd.f32 %s1596_s4, %s1441_s3 }
 0x247   :  { %1603 = sst [smem:[#allocation2 + $0x1]] %s1601_s25 }
 0x248   :  { %1599 = sst [smem:[#allocation2]] %s1597_s26 }
 0x249   :  { %1927 = shalt.err (!%p1924_p4)
}
 0x24a   :  { %s1930_s28 = smov [#allocation2]  }
 0x24b   :  { %1613 = dma.smem_to_vmem %s1930_s28, 16, %s1611_s22, [#allocation3]  }
 0x24c   :  { %1928 = dma.done.wait [#allocation3], 16  }
 0x24d   :  { %1929 = vsyncadd [#allocation3], 4294967280 }
 0x24e   :  { %1617 = sfence }
 0x24f   :  { %1618 = vsyncpa [#allocation3], 1 }

</bundles_post_ra>
